<compile_context>
chip_gen: v5e
topology: v5e:2x2
jax: 0.10.0
libtpu: 0.0.40
codegen_flags: <defaults>
</compile_context>

<pallas_src>
import functools
import math

import jax
import jax.numpy as jnp
import numpy as np
from jax import lax
from jax.experimental import pallas as pl
from jax.experimental.pallas import tpu as pltpu

D_MODEL = 32
NUM_HEADS = 4
D_HEAD = D_MODEL // NUM_HEADS
MAX_LEN = 16
NEG_INF = -1e30   # masked logits; exp underflows to exactly 0 (== masked_fill(-inf))
ER_PAD = 128      # lane-aligned length of the padded relative-position axis


def _rga_kernel(x_ref, w_ref, b_ref, er_ref, o_ref, *, bt, seq_len, num_heads):
    S = seq_len
    D = x_ref.shape[1]
    H = num_heads
    dh = D // H

    # Fused QKV projection: one MXU matmul with all batch rows folded into M.
    x = x_ref[...]                                                     # (bt*S, D)
    qkv = jnp.dot(x, w_ref[...], preferred_element_type=jnp.float32) + b_ref[...]

    # All (batch-row, head) QEr products in ONE MXU call against the
    # block-diagonal zero-padded Er^T operand; each head's slice is a
    # lane-aligned (S, 128) tile.
    qer_all = jnp.dot(qkv[:, :D], er_ref[...],
                      preferred_element_type=jnp.float32)              # (bt*S, H*128)

    # Causal mask on the lane-padded (S, ER_PAD) logits tile: row i keeps
    # columns j <= i (which also implies j < S, so padded keys are masked too).
    row = lax.broadcasted_iota(jnp.int32, (S, ER_PAD), 0)
    col = lax.broadcasted_iota(jnp.int32, (S, ER_PAD), 1)
    causal = col <= row

    kv_zero = jnp.zeros((ER_PAD - S, dh), jnp.float32)   # hoisted out of the loops
    scale = 1.0 / math.sqrt(dh)

    batch_out = []
    for b in range(bt):                       # tiny static loops (bt*H iterations)
        rows = slice(b * S, (b + 1) * S)
        head_out = []
        for h in range(H):
            c0 = h * dh
            q = qkv[rows, c0:c0 + dh]                                  # (S, dh)
            k = qkv[rows, D + c0:D + c0 + dh]                          # (S, dh)
            v = qkv[rows, 2 * D + c0:2 * D + c0 + dh]                  # (S, dh)

            # Zero-pad keys/values to ER_PAD rows so QK^T and attn@V run on
            # native 128-wide tiles; the extra keys are masked below.
            k_ext = jnp.concatenate([k, kv_zero], axis=0)              # (ER_PAD, dh)
            v_ext = jnp.concatenate([v, kv_zero], axis=0)              # (ER_PAD, dh)

            # QK^T (contract d_head axis, no explicit transpose).
            qk = lax.dot_general(q, k_ext, (((1,), (1,)), ((), ())),
                                 preferred_element_type=jnp.float32)   # (S, ER_PAD)

            # Skew as ONE strided roll (XLU): row i rotated right by (i+1),
            # so causal lane j holds q_i . Er[j - i + S - 1]; all other lanes
            # read zero pad / irrelevant values and are masked.
            qer = qer_all[rows, h * ER_PAD:(h + 1) * ER_PAD]           # (S, ER_PAD)
            srel = pltpu.roll(qer, 1, 1, stride=1, stride_axis=0)      # (S, ER_PAD)

            logits = (qk + srel) * scale
            logits = jnp.where(causal, logits, NEG_INF)

            # Softmax across the full 128 lanes; masked lanes exp to exactly 0.
            m = jnp.max(logits, axis=-1, keepdims=True)
            e = jnp.exp(logits - m)
            inv = pl.reciprocal(jnp.sum(e, axis=-1, keepdims=True))    # exact
            attn = e * inv

            head_out.append(jnp.dot(attn, v_ext,
                                    preferred_element_type=jnp.float32))  # (S, dh)
        batch_out.append(jnp.concatenate(head_out, axis=-1))              # (S, D)

    # Single lane-dense full-block store.
    o_ref[...] = jnp.concatenate(batch_out, axis=0).astype(o_ref.dtype)


def relative_global_attention(x, params, max_len=MAX_LEN, batch_tile=None):
    B, S, D = x.shape
    H = NUM_HEADS
    dh = D // H
    if S > max_len:
        raise ValueError("sequence length exceeds model capacity")

    # Pad S up to a sublane multiple (>= 8) so kernel tiles stay aligned.
    # Srel depends only on (j - i), so padding is transparent: padded query
    # rows are sliced off, padded keys are never attended (causal mask).
    S_pad = max(8, -(-S // 8) * 8)
    assert S_pad <= ER_PAD, "roll-based skew needs S <= 128"

    bt = B if batch_tile is None else batch_tile   # batch_tile=B//2 -> 2-step grid for v7x 2-TC sharding
    assert B % bt == 0

    # Fused QKV weights/bias. Weights stored (in, out) so x @ W + b matches
    # PyTorch's x @ W.T + b.
    w_qkv = jnp.concatenate([params["wq"], params["wk"], params["wv"]], axis=1)   # (D, 3D)
    b_qkv = jnp.concatenate([params["bq"], params["bk"], params["bv"]])[None, :]  # (1, 3D)

    # Er slice for the (possibly padded) sequence length; zero-fill where the
    # relative index falls before the table start (only reachable from padded
    # query rows, which are discarded).
    start = max_len - S_pad
    if start >= 0:
        er_slice = params["Er"][start:start + S_pad, :]                           # (S_pad, dh)
    else:
        er_slice = jnp.concatenate(
            [jnp.zeros((-start, dh), jnp.float32), params["Er"]], axis=0)

    # Block-diagonal Er^T operand: head h's (dh, 128) block sits at
    # rows [h*dh,(h+1)*dh) x cols [h*128,(h+1)*128), with the S_pad real
    # relative embeddings occupying the LAST S_pad lanes of each block.
    er_head_t = jnp.zeros((dh, ER_PAD), jnp.float32).at[:, ER_PAD - S_pad:].set(er_slice.T)
    er_blk = jnp.zeros((D, H * ER_PAD), jnp.float32)
    for h in range(H):
        er_blk = er_blk.at[h * dh:(h + 1) * dh, h * ER_PAD:(h + 1) * ER_PAD].set(er_head_t)

    if S_pad != S:
        x = jnp.pad(x, ((0, 0), (0, S_pad - S), (0, 0)))
    x2 = x.reshape(B * S_pad, D)   # fold batch rows into the matmul M dimension

    out2 = pl.pallas_call(
        functools.partial(_rga_kernel, bt=bt, seq_len=S_pad, num_heads=H),
        out_shape=jax.ShapeDtypeStruct((B * S_pad, D), jnp.float32),
        grid=(B // bt,),
        in_specs=[
            pl.BlockSpec((bt * S_pad, D), lambda i: (i, 0)),      # x rows for this batch tile
            pl.BlockSpec((D, 3 * D), lambda i: (0, 0)),           # fused Wqkv (VMEM-resident)
            pl.BlockSpec((1, 3 * D), lambda i: (0, 0)),           # fused bias
            pl.BlockSpec((D, H * ER_PAD), lambda i: (0, 0)),      # block-diagonal padded Er^T
        ],
        out_specs=pl.BlockSpec((bt * S_pad, D), lambda i: (i, 0)),
        compiler_params=pltpu.CompilerParams(dimension_semantics=("parallel",)),
    )(x2, w_qkv, b_qkv, er_blk)

    out = out2.reshape(B, S_pad, D)
    # TODO(synk): nn.Dropout(p=0) is the identity; no dropout implemented.
    return out[:, :S, :] if S_pad != S else out


def reference(x, params, max_len=MAX_LEN):
    """Pure-JAX mirror of the PyTorch forward (including the pad/reshape skew)."""
    B, S, D = x.shape
    H, dh = NUM_HEADS, D // NUM_HEADS
    k = (x @ params["wk"] + params["bk"]).reshape(B, S, H, dh)
    v = (x @ params["wv"] + params["bv"]).reshape(B, S, H, dh)
    q = (x @ params["wq"] + params["bq"]).reshape(B, S, H, dh)
    k_t = jnp.transpose(k, (0, 2, 3, 1))           # (B, H, dh, S)
    v = jnp.transpose(v, (0, 2, 1, 3))             # (B, H, S, dh)
    q = jnp.transpose(q, (0, 2, 1, 3))             # (B, H, S, dh)
    Er_t = params["Er"][max_len - S:, :].T         # (dh, S)
    QEr = jnp.matmul(q, Er_t)                      # (B, H, S, S)
    padded = jnp.pad(QEr, ((0, 0), (0, 0), (0, 0), (1, 0)))
    Srel = padded.reshape(B, H, S + 1, S)[:, :, 1:, :]
    QK_t = jnp.matmul(q, k_t)
    attn = (QK_t + Srel) / math.sqrt(dh)
    mask = jnp.tril(jnp.ones((S, S)))[None, None]
    attn = jnp.where(mask == 0, -jnp.inf, attn)
    attn = jax.nn.softmax(attn, axis=-1)
    out = jnp.matmul(attn, v)
    out = jnp.transpose(out, (0, 2, 1, 3)).reshape(B, S, D)
    return out


if __name__ == "__main__":
    B, S, D = 2, 8, D_MODEL

    key = jax.random.PRNGKey(0)
    ks = jax.random.split(key, 8)
    params = {
        "wq": jax.random.normal(ks[0], (D, D), jnp.float32) * 0.1,
        "bq": jax.random.normal(ks[1], (D,), jnp.float32) * 0.1,
        "wk": jax.random.normal(ks[2], (D, D), jnp.float32) * 0.1,
        "bk": jax.random.normal(ks[3], (D,), jnp.float32) * 0.1,
        "wv": jax.random.normal(ks[4], (D, D), jnp.float32) * 0.1,
        "bv": jax.random.normal(ks[5], (D,), jnp.float32) * 0.1,
        "Er": jax.random.normal(ks[6], (MAX_LEN, D_HEAD), jnp.float32),
    }
    x = jax.random.normal(ks[7], (B, S, D), jnp.float32)

    out = jax.block_until_ready(relative_global_attention(x, params))
    ref = jax.block_until_ready(reference(x, params))
    np.testing.assert_allclose(np.asarray(out), np.asarray(ref), atol=1e-4, rtol=1e-4)

    print("KERNEL_OK")
</pallas_src>

<mosaic_0001>
module attributes {stable_mosaic.version = 11 : i64} {
  func.func @_rga_kernel(%arg0: i32, %arg1: memref<16x32xf32, #tpu.memory_space<vmem>>, %arg2: memref<32x96xf32, #tpu.memory_space<vmem>>, %arg3: memref<1x96xf32, #tpu.memory_space<vmem>>, %arg4: memref<32x512xf32, #tpu.memory_space<vmem>>, %arg5: memref<16x32xf32, #tpu.memory_space<vmem>>) attributes {dimension_semantics = [#tpu.dimension_semantics<parallel>], iteration_bounds = array<i64: 1>, scalar_prefetch = 0 : i64, scratch_operands = 0 : i64, tpu.core_type = #tpu.core_type<tc>, window_params = [{transform_indices = @transform_0, window_bounds = array<i64: 16, 32>}, {pipeline_mode = #tpu.pipeline_mode<synchronous>, transform_indices = @transform_1, window_bounds = array<i64: 32, 96>}, {pipeline_mode = #tpu.pipeline_mode<synchronous>, transform_indices = @transform_2, window_bounds = array<i64: 1, 96>}, {pipeline_mode = #tpu.pipeline_mode<synchronous>, transform_indices = @transform_3, window_bounds = array<i64: 32, 512>}, {transform_indices = @transform_4, window_bounds = array<i64: 16, 32>}]} {
    %c0 = arith.constant 0 : index
    %c0_0 = arith.constant 0 : index
    %0 = vector.load %arg1[%c0, %c0_0] : memref<16x32xf32, #tpu.memory_space<vmem>>, vector<16x32xf32>
    %c0_1 = arith.constant 0 : index
    %c0_2 = arith.constant 0 : index
    %1 = vector.load %arg2[%c0_1, %c0_2] : memref<32x96xf32, #tpu.memory_space<vmem>>, vector<32x96xf32>
    %cst = arith.constant dense<0.000000e+00> : vector<16x96xf32>
    %2 = tpu.matmul %0, %1, %cst {dimension_numbers = #tpu.dot_dimension_numbers<[1], [0], [0], [1], [0, 0, 1, 1], [], []>} : vector<16x32xf32>, vector<32x96xf32>, vector<16x96xf32> -> vector<16x96xf32>
    %c0_3 = arith.constant 0 : index
    %c0_4 = arith.constant 0 : index
    %3 = vector.load %arg3[%c0_3, %c0_4] : memref<1x96xf32, #tpu.memory_space<vmem>>, vector<1x96xf32>
    %4 = vector.broadcast %3 : vector<1x96xf32> to vector<16x96xf32>
    %5 = arith.addf %2, %4 : vector<16x96xf32>
    %6 = vector.extract_strided_slice %5 {offsets = [0, 0], sizes = [16, 32], strides = [1, 1]} : vector<16x96xf32> to vector<16x32xf32>
    %c0_5 = arith.constant 0 : index
    %c0_6 = arith.constant 0 : index
    %7 = vector.load %arg4[%c0_5, %c0_6] : memref<32x512xf32, #tpu.memory_space<vmem>>, vector<32x512xf32>
    %cst_7 = arith.constant dense<0.000000e+00> : vector<16x512xf32>
    %8 = tpu.matmul %6, %7, %cst_7 {dimension_numbers = #tpu.dot_dimension_numbers<[1], [0], [0], [1], [0, 0, 1, 1], [], []>} : vector<16x32xf32>, vector<32x512xf32>, vector<16x512xf32> -> vector<16x512xf32>
    %9 = tpu.iota {dimensions = array<i32: 0>} : vector<8x128xi32>
    %10 = tpu.iota {dimensions = array<i32: 1>} : vector<8x128xi32>
    %11 = arith.cmpi sle, %10, %9 : vector<8x128xi32>
    %cst_8 = arith.constant 0.000000e+00 : f32
    %12 = vector.broadcast %cst_8 : f32 to vector<120x8xf32>
    %13 = vector.extract_strided_slice %5 {offsets = [0, 0], sizes = [8, 8], strides = [1, 1]} : vector<16x96xf32> to vector<8x8xf32>
    %14 = vector.extract_strided_slice %5 {offsets = [0, 32], sizes = [8, 8], strides = [1, 1]} : vector<16x96xf32> to vector<8x8xf32>
    %15 = vector.extract_strided_slice %5 {offsets = [0, 64], sizes = [8, 8], strides = [1, 1]} : vector<16x96xf32> to vector<8x8xf32>
    %16 = tpu.concatenate %14, %12 in 0 : vector<8x8xf32>, vector<120x8xf32> -> vector<128x8xf32>
    %17 = tpu.concatenate %15, %12 in 0 : vector<8x8xf32>, vector<120x8xf32> -> vector<128x8xf32>
    %cst_9 = arith.constant dense<0.000000e+00> : vector<8x128xf32>
    %18 = tpu.matmul %13, %16, %cst_9 {dimension_numbers = #tpu.dot_dimension_numbers<[1], [1], [0], [0], [0, 0, 1, 0], [], []>} : vector<8x8xf32>, vector<128x8xf32>, vector<8x128xf32> -> vector<8x128xf32>
    %19 = vector.extract_strided_slice %8 {offsets = [0, 0], sizes = [8, 128], strides = [1, 1]} : vector<16x512xf32> to vector<8x128xf32>
    %c1_i32 = arith.constant 1 : i32
    %20 = tpu.dynamic_rotate %19 by %c1_i32 dim 1 {stride = 1 : si32, stride_dimension = 0 : si32} : vector<8x128xf32>, i32 -> vector<8x128xf32>
    %21 = arith.addf %18, %20 : vector<8x128xf32>
    %cst_10 = arith.constant 0.353553385 : f32
    %22 = vector.broadcast %cst_10 : f32 to vector<8x128xf32>
    %23 = arith.mulf %21, %22 : vector<8x128xf32>
    %cst_11 = arith.constant -1.000000e+30 : f32
    %24 = vector.broadcast %cst_11 : f32 to vector<8x128xf32>
    %25 = arith.select %11, %23, %24 : vector<8x128xi1>, vector<8x128xf32>
    %cst_12 = arith.constant dense<0xFF800000> : vector<8xf32>
    %26 = vector.multi_reduction <maximumf>, %25, %cst_12 [1] : vector<8x128xf32> to vector<8xf32>
    %27 = vector.shape_cast %26 : vector<8xf32> to vector<8x1xf32>
    %28 = vector.broadcast %27 : vector<8x1xf32> to vector<8x128xf32>
    %29 = arith.subf %25, %28 : vector<8x128xf32>
    %30 = math.exp %29 : vector<8x128xf32>
    %cst_13 = arith.constant dense<0.000000e+00> : vector<8xf32>
    %31 = vector.multi_reduction <add>, %30, %cst_13 [1] : vector<8x128xf32> to vector<8xf32>
    %32 = vector.shape_cast %31 : vector<8xf32> to vector<8x1xf32>
    %33 = tpu.reciprocal %32 : vector<8x1xf32> -> vector<8x1xf32>
    %34 = vector.broadcast %33 : vector<8x1xf32> to vector<8x128xf32>
    %35 = arith.mulf %30, %34 : vector<8x128xf32>
    %cst_14 = arith.constant dense<0.000000e+00> : vector<8x8xf32>
    %36 = tpu.matmul %35, %17, %cst_14 {dimension_numbers = #tpu.dot_dimension_numbers<[1], [0], [0], [1], [0, 0, 1, 1], [], []>} : vector<8x128xf32>, vector<128x8xf32>, vector<8x8xf32> -> vector<8x8xf32>
    %37 = vector.extract_strided_slice %5 {offsets = [0, 8], sizes = [8, 8], strides = [1, 1]} : vector<16x96xf32> to vector<8x8xf32>
    %38 = vector.extract_strided_slice %5 {offsets = [0, 40], sizes = [8, 8], strides = [1, 1]} : vector<16x96xf32> to vector<8x8xf32>
    %39 = vector.extract_strided_slice %5 {offsets = [0, 72], sizes = [8, 8], strides = [1, 1]} : vector<16x96xf32> to vector<8x8xf32>
    %40 = tpu.concatenate %38, %12 in 0 : vector<8x8xf32>, vector<120x8xf32> -> vector<128x8xf32>
    %41 = tpu.concatenate %39, %12 in 0 : vector<8x8xf32>, vector<120x8xf32> -> vector<128x8xf32>
    %cst_15 = arith.constant dense<0.000000e+00> : vector<8x128xf32>
    %42 = tpu.matmul %37, %40, %cst_15 {dimension_numbers = #tpu.dot_dimension_numbers<[1], [1], [0], [0], [0, 0, 1, 0], [], []>} : vector<8x8xf32>, vector<128x8xf32>, vector<8x128xf32> -> vector<8x128xf32>
    %43 = vector.extract_strided_slice %8 {offsets = [0, 128], sizes = [8, 128], strides = [1, 1]} : vector<16x512xf32> to vector<8x128xf32>
    %c1_i32_16 = arith.constant 1 : i32
    %44 = tpu.dynamic_rotate %43 by %c1_i32_16 dim 1 {stride = 1 : si32, stride_dimension = 0 : si32} : vector<8x128xf32>, i32 -> vector<8x128xf32>
    %45 = arith.addf %42, %44 : vector<8x128xf32>
    %cst_17 = arith.constant 0.353553385 : f32
    %46 = vector.broadcast %cst_17 : f32 to vector<8x128xf32>
    %47 = arith.mulf %45, %46 : vector<8x128xf32>
    %cst_18 = arith.constant -1.000000e+30 : f32
    %48 = vector.broadcast %cst_18 : f32 to vector<8x128xf32>
    %49 = arith.select %11, %47, %48 : vector<8x128xi1>, vector<8x128xf32>
    %cst_19 = arith.constant dense<0xFF800000> : vector<8xf32>
    %50 = vector.multi_reduction <maximumf>, %49, %cst_19 [1] : vector<8x128xf32> to vector<8xf32>
    %51 = vector.shape_cast %50 : vector<8xf32> to vector<8x1xf32>
    %52 = vector.broadcast %51 : vector<8x1xf32> to vector<8x128xf32>
    %53 = arith.subf %49, %52 : vector<8x128xf32>
    %54 = math.exp %53 : vector<8x128xf32>
    %cst_20 = arith.constant dense<0.000000e+00> : vector<8xf32>
    %55 = vector.multi_reduction <add>, %54, %cst_20 [1] : vector<8x128xf32> to vector<8xf32>
    %56 = vector.shape_cast %55 : vector<8xf32> to vector<8x1xf32>
    %57 = tpu.reciprocal %56 : vector<8x1xf32> -> vector<8x1xf32>
    %58 = vector.broadcast %57 : vector<8x1xf32> to vector<8x128xf32>
    %59 = arith.mulf %54, %58 : vector<8x128xf32>
    %cst_21 = arith.constant dense<0.000000e+00> : vector<8x8xf32>
    %60 = tpu.matmul %59, %41, %cst_21 {dimension_numbers = #tpu.dot_dimension_numbers<[1], [0], [0], [1], [0, 0, 1, 1], [], []>} : vector<8x128xf32>, vector<128x8xf32>, vector<8x8xf32> -> vector<8x8xf32>
    %61 = vector.extract_strided_slice %5 {offsets = [0, 16], sizes = [8, 8], strides = [1, 1]} : vector<16x96xf32> to vector<8x8xf32>
    %62 = vector.extract_strided_slice %5 {offsets = [0, 48], sizes = [8, 8], strides = [1, 1]} : vector<16x96xf32> to vector<8x8xf32>
    %63 = vector.extract_strided_slice %5 {offsets = [0, 80], sizes = [8, 8], strides = [1, 1]} : vector<16x96xf32> to vector<8x8xf32>
    %64 = tpu.concatenate %62, %12 in 0 : vector<8x8xf32>, vector<120x8xf32> -> vector<128x8xf32>
    %65 = tpu.concatenate %63, %12 in 0 : vector<8x8xf32>, vector<120x8xf32> -> vector<128x8xf32>
    %cst_22 = arith.constant dense<0.000000e+00> : vector<8x128xf32>
    %66 = tpu.matmul %61, %64, %cst_22 {dimension_numbers = #tpu.dot_dimension_numbers<[1], [1], [0], [0], [0, 0, 1, 0], [], []>} : vector<8x8xf32>, vector<128x8xf32>, vector<8x128xf32> -> vector<8x128xf32>
    %67 = vector.extract_strided_slice %8 {offsets = [0, 256], sizes = [8, 128], strides = [1, 1]} : vector<16x512xf32> to vector<8x128xf32>
    %c1_i32_23 = arith.constant 1 : i32
    %68 = tpu.dynamic_rotate %67 by %c1_i32_23 dim 1 {stride = 1 : si32, stride_dimension = 0 : si32} : vector<8x128xf32>, i32 -> vector<8x128xf32>
    %69 = arith.addf %66, %68 : vector<8x128xf32>
    %cst_24 = arith.constant 0.353553385 : f32
    %70 = vector.broadcast %cst_24 : f32 to vector<8x128xf32>
    %71 = arith.mulf %69, %70 : vector<8x128xf32>
    %cst_25 = arith.constant -1.000000e+30 : f32
    %72 = vector.broadcast %cst_25 : f32 to vector<8x128xf32>
    %73 = arith.select %11, %71, %72 : vector<8x128xi1>, vector<8x128xf32>
    %cst_26 = arith.constant dense<0xFF800000> : vector<8xf32>
    %74 = vector.multi_reduction <maximumf>, %73, %cst_26 [1] : vector<8x128xf32> to vector<8xf32>
    %75 = vector.shape_cast %74 : vector<8xf32> to vector<8x1xf32>
    %76 = vector.broadcast %75 : vector<8x1xf32> to vector<8x128xf32>
    %77 = arith.subf %73, %76 : vector<8x128xf32>
    %78 = math.exp %77 : vector<8x128xf32>
    %cst_27 = arith.constant dense<0.000000e+00> : vector<8xf32>
    %79 = vector.multi_reduction <add>, %78, %cst_27 [1] : vector<8x128xf32> to vector<8xf32>
    %80 = vector.shape_cast %79 : vector<8xf32> to vector<8x1xf32>
    %81 = tpu.reciprocal %80 : vector<8x1xf32> -> vector<8x1xf32>
    %82 = vector.broadcast %81 : vector<8x1xf32> to vector<8x128xf32>
    %83 = arith.mulf %78, %82 : vector<8x128xf32>
    %cst_28 = arith.constant dense<0.000000e+00> : vector<8x8xf32>
    %84 = tpu.matmul %83, %65, %cst_28 {dimension_numbers = #tpu.dot_dimension_numbers<[1], [0], [0], [1], [0, 0, 1, 1], [], []>} : vector<8x128xf32>, vector<128x8xf32>, vector<8x8xf32> -> vector<8x8xf32>
    %85 = vector.extract_strided_slice %5 {offsets = [0, 24], sizes = [8, 8], strides = [1, 1]} : vector<16x96xf32> to vector<8x8xf32>
    %86 = vector.extract_strided_slice %5 {offsets = [0, 56], sizes = [8, 8], strides = [1, 1]} : vector<16x96xf32> to vector<8x8xf32>
    %87 = vector.extract_strided_slice %5 {offsets = [0, 88], sizes = [8, 8], strides = [1, 1]} : vector<16x96xf32> to vector<8x8xf32>
    %88 = tpu.concatenate %86, %12 in 0 : vector<8x8xf32>, vector<120x8xf32> -> vector<128x8xf32>
    %89 = tpu.concatenate %87, %12 in 0 : vector<8x8xf32>, vector<120x8xf32> -> vector<128x8xf32>
    %cst_29 = arith.constant dense<0.000000e+00> : vector<8x128xf32>
    %90 = tpu.matmul %85, %88, %cst_29 {dimension_numbers = #tpu.dot_dimension_numbers<[1], [1], [0], [0], [0, 0, 1, 0], [], []>} : vector<8x8xf32>, vector<128x8xf32>, vector<8x128xf32> -> vector<8x128xf32>
    %91 = vector.extract_strided_slice %8 {offsets = [0, 384], sizes = [8, 128], strides = [1, 1]} : vector<16x512xf32> to vector<8x128xf32>
    %c1_i32_30 = arith.constant 1 : i32
    %92 = tpu.dynamic_rotate %91 by %c1_i32_30 dim 1 {stride = 1 : si32, stride_dimension = 0 : si32} : vector<8x128xf32>, i32 -> vector<8x128xf32>
    %93 = arith.addf %90, %92 : vector<8x128xf32>
    %cst_31 = arith.constant 0.353553385 : f32
    %94 = vector.broadcast %cst_31 : f32 to vector<8x128xf32>
    %95 = arith.mulf %93, %94 : vector<8x128xf32>
    %cst_32 = arith.constant -1.000000e+30 : f32
    %96 = vector.broadcast %cst_32 : f32 to vector<8x128xf32>
    %97 = arith.select %11, %95, %96 : vector<8x128xi1>, vector<8x128xf32>
    %cst_33 = arith.constant dense<0xFF800000> : vector<8xf32>
    %98 = vector.multi_reduction <maximumf>, %97, %cst_33 [1] : vector<8x128xf32> to vector<8xf32>
    %99 = vector.shape_cast %98 : vector<8xf32> to vector<8x1xf32>
    %100 = vector.broadcast %99 : vector<8x1xf32> to vector<8x128xf32>
    %101 = arith.subf %97, %100 : vector<8x128xf32>
    %102 = math.exp %101 : vector<8x128xf32>
    %cst_34 = arith.constant dense<0.000000e+00> : vector<8xf32>
    %103 = vector.multi_reduction <add>, %102, %cst_34 [1] : vector<8x128xf32> to vector<8xf32>
    %104 = vector.shape_cast %103 : vector<8xf32> to vector<8x1xf32>
    %105 = tpu.reciprocal %104 : vector<8x1xf32> -> vector<8x1xf32>
    %106 = vector.broadcast %105 : vector<8x1xf32> to vector<8x128xf32>
    %107 = arith.mulf %102, %106 : vector<8x128xf32>
    %cst_35 = arith.constant dense<0.000000e+00> : vector<8x8xf32>
    %108 = tpu.matmul %107, %89, %cst_35 {dimension_numbers = #tpu.dot_dimension_numbers<[1], [0], [0], [1], [0, 0, 1, 1], [], []>} : vector<8x128xf32>, vector<128x8xf32>, vector<8x8xf32> -> vector<8x8xf32>
    %109 = tpu.concatenate %36, %60, %84, %108 in 1 : vector<8x8xf32>, vector<8x8xf32>, vector<8x8xf32>, vector<8x8xf32> -> vector<8x32xf32>
    %110 = vector.extract_strided_slice %5 {offsets = [8, 0], sizes = [8, 8], strides = [1, 1]} : vector<16x96xf32> to vector<8x8xf32>
    %111 = vector.extract_strided_slice %5 {offsets = [8, 32], sizes = [8, 8], strides = [1, 1]} : vector<16x96xf32> to vector<8x8xf32>
    %112 = vector.extract_strided_slice %5 {offsets = [8, 64], sizes = [8, 8], strides = [1, 1]} : vector<16x96xf32> to vector<8x8xf32>
    %113 = tpu.concatenate %111, %12 in 0 : vector<8x8xf32>, vector<120x8xf32> -> vector<128x8xf32>
    %114 = tpu.concatenate %112, %12 in 0 : vector<8x8xf32>, vector<120x8xf32> -> vector<128x8xf32>
    %cst_36 = arith.constant dense<0.000000e+00> : vector<8x128xf32>
    %115 = tpu.matmul %110, %113, %cst_36 {dimension_numbers = #tpu.dot_dimension_numbers<[1], [1], [0], [0], [0, 0, 1, 0], [], []>} : vector<8x8xf32>, vector<128x8xf32>, vector<8x128xf32> -> vector<8x128xf32>
    %116 = vector.extract_strided_slice %8 {offsets = [8, 0], sizes = [8, 128], strides = [1, 1]} : vector<16x512xf32> to vector<8x128xf32>
    %c1_i32_37 = arith.constant 1 : i32
    %117 = tpu.dynamic_rotate %116 by %c1_i32_37 dim 1 {stride = 1 : si32, stride_dimension = 0 : si32} : vector<8x128xf32>, i32 -> vector<8x128xf32>
    %118 = arith.addf %115, %117 : vector<8x128xf32>
    %cst_38 = arith.constant 0.353553385 : f32
    %119 = vector.broadcast %cst_38 : f32 to vector<8x128xf32>
    %120 = arith.mulf %118, %119 : vector<8x128xf32>
    %cst_39 = arith.constant -1.000000e+30 : f32
    %121 = vector.broadcast %cst_39 : f32 to vector<8x128xf32>
    %122 = arith.select %11, %120, %121 : vector<8x128xi1>, vector<8x128xf32>
    %cst_40 = arith.constant dense<0xFF800000> : vector<8xf32>
    %123 = vector.multi_reduction <maximumf>, %122, %cst_40 [1] : vector<8x128xf32> to vector<8xf32>
    %124 = vector.shape_cast %123 : vector<8xf32> to vector<8x1xf32>
    %125 = vector.broadcast %124 : vector<8x1xf32> to vector<8x128xf32>
    %126 = arith.subf %122, %125 : vector<8x128xf32>
    %127 = math.exp %126 : vector<8x128xf32>
    %cst_41 = arith.constant dense<0.000000e+00> : vector<8xf32>
    %128 = vector.multi_reduction <add>, %127, %cst_41 [1] : vector<8x128xf32> to vector<8xf32>
    %129 = vector.shape_cast %128 : vector<8xf32> to vector<8x1xf32>
    %130 = tpu.reciprocal %129 : vector<8x1xf32> -> vector<8x1xf32>
    %131 = vector.broadcast %130 : vector<8x1xf32> to vector<8x128xf32>
    %132 = arith.mulf %127, %131 : vector<8x128xf32>
    %cst_42 = arith.constant dense<0.000000e+00> : vector<8x8xf32>
    %133 = tpu.matmul %132, %114, %cst_42 {dimension_numbers = #tpu.dot_dimension_numbers<[1], [0], [0], [1], [0, 0, 1, 1], [], []>} : vector<8x128xf32>, vector<128x8xf32>, vector<8x8xf32> -> vector<8x8xf32>
    %134 = vector.extract_strided_slice %5 {offsets = [8, 8], sizes = [8, 8], strides = [1, 1]} : vector<16x96xf32> to vector<8x8xf32>
    %135 = vector.extract_strided_slice %5 {offsets = [8, 40], sizes = [8, 8], strides = [1, 1]} : vector<16x96xf32> to vector<8x8xf32>
    %136 = vector.extract_strided_slice %5 {offsets = [8, 72], sizes = [8, 8], strides = [1, 1]} : vector<16x96xf32> to vector<8x8xf32>
    %137 = tpu.concatenate %135, %12 in 0 : vector<8x8xf32>, vector<120x8xf32> -> vector<128x8xf32>
    %138 = tpu.concatenate %136, %12 in 0 : vector<8x8xf32>, vector<120x8xf32> -> vector<128x8xf32>
    %cst_43 = arith.constant dense<0.000000e+00> : vector<8x128xf32>
    %139 = tpu.matmul %134, %137, %cst_43 {dimension_numbers = #tpu.dot_dimension_numbers<[1], [1], [0], [0], [0, 0, 1, 0], [], []>} : vector<8x8xf32>, vector<128x8xf32>, vector<8x128xf32> -> vector<8x128xf32>
    %140 = vector.extract_strided_slice %8 {offsets = [8, 128], sizes = [8, 128], strides = [1, 1]} : vector<16x512xf32> to vector<8x128xf32>
    %c1_i32_44 = arith.constant 1 : i32
    %141 = tpu.dynamic_rotate %140 by %c1_i32_44 dim 1 {stride = 1 : si32, stride_dimension = 0 : si32} : vector<8x128xf32>, i32 -> vector<8x128xf32>
    %142 = arith.addf %139, %141 : vector<8x128xf32>
    %cst_45 = arith.constant 0.353553385 : f32
    %143 = vector.broadcast %cst_45 : f32 to vector<8x128xf32>
    %144 = arith.mulf %142, %143 : vector<8x128xf32>
    %cst_46 = arith.constant -1.000000e+30 : f32
    %145 = vector.broadcast %cst_46 : f32 to vector<8x128xf32>
    %146 = arith.select %11, %144, %145 : vector<8x128xi1>, vector<8x128xf32>
    %cst_47 = arith.constant dense<0xFF800000> : vector<8xf32>
    %147 = vector.multi_reduction <maximumf>, %146, %cst_47 [1] : vector<8x128xf32> to vector<8xf32>
    %148 = vector.shape_cast %147 : vector<8xf32> to vector<8x1xf32>
    %149 = vector.broadcast %148 : vector<8x1xf32> to vector<8x128xf32>
    %150 = arith.subf %146, %149 : vector<8x128xf32>
    %151 = math.exp %150 : vector<8x128xf32>
    %cst_48 = arith.constant dense<0.000000e+00> : vector<8xf32>
    %152 = vector.multi_reduction <add>, %151, %cst_48 [1] : vector<8x128xf32> to vector<8xf32>
    %153 = vector.shape_cast %152 : vector<8xf32> to vector<8x1xf32>
    %154 = tpu.reciprocal %153 : vector<8x1xf32> -> vector<8x1xf32>
    %155 = vector.broadcast %154 : vector<8x1xf32> to vector<8x128xf32>
    %156 = arith.mulf %151, %155 : vector<8x128xf32>
    %cst_49 = arith.constant dense<0.000000e+00> : vector<8x8xf32>
    %157 = tpu.matmul %156, %138, %cst_49 {dimension_numbers = #tpu.dot_dimension_numbers<[1], [0], [0], [1], [0, 0, 1, 1], [], []>} : vector<8x128xf32>, vector<128x8xf32>, vector<8x8xf32> -> vector<8x8xf32>
    %158 = vector.extract_strided_slice %5 {offsets = [8, 16], sizes = [8, 8], strides = [1, 1]} : vector<16x96xf32> to vector<8x8xf32>
    %159 = vector.extract_strided_slice %5 {offsets = [8, 48], sizes = [8, 8], strides = [1, 1]} : vector<16x96xf32> to vector<8x8xf32>
    %160 = vector.extract_strided_slice %5 {offsets = [8, 80], sizes = [8, 8], strides = [1, 1]} : vector<16x96xf32> to vector<8x8xf32>
    %161 = tpu.concatenate %159, %12 in 0 : vector<8x8xf32>, vector<120x8xf32> -> vector<128x8xf32>
    %162 = tpu.concatenate %160, %12 in 0 : vector<8x8xf32>, vector<120x8xf32> -> vector<128x8xf32>
    %cst_50 = arith.constant dense<0.000000e+00> : vector<8x128xf32>
    %163 = tpu.matmul %158, %161, %cst_50 {dimension_numbers = #tpu.dot_dimension_numbers<[1], [1], [0], [0], [0, 0, 1, 0], [], []>} : vector<8x8xf32>, vector<128x8xf32>, vector<8x128xf32> -> vector<8x128xf32>
    %164 = vector.extract_strided_slice %8 {offsets = [8, 256], sizes = [8, 128], strides = [1, 1]} : vector<16x512xf32> to vector<8x128xf32>
    %c1_i32_51 = arith.constant 1 : i32
    %165 = tpu.dynamic_rotate %164 by %c1_i32_51 dim 1 {stride = 1 : si32, stride_dimension = 0 : si32} : vector<8x128xf32>, i32 -> vector<8x128xf32>
    %166 = arith.addf %163, %165 : vector<8x128xf32>
    %cst_52 = arith.constant 0.353553385 : f32
    %167 = vector.broadcast %cst_52 : f32 to vector<8x128xf32>
    %168 = arith.mulf %166, %167 : vector<8x128xf32>
    %cst_53 = arith.constant -1.000000e+30 : f32
    %169 = vector.broadcast %cst_53 : f32 to vector<8x128xf32>
    %170 = arith.select %11, %168, %169 : vector<8x128xi1>, vector<8x128xf32>
    %cst_54 = arith.constant dense<0xFF800000> : vector<8xf32>
    %171 = vector.multi_reduction <maximumf>, %170, %cst_54 [1] : vector<8x128xf32> to vector<8xf32>
    %172 = vector.shape_cast %171 : vector<8xf32> to vector<8x1xf32>
    %173 = vector.broadcast %172 : vector<8x1xf32> to vector<8x128xf32>
    %174 = arith.subf %170, %173 : vector<8x128xf32>
    %175 = math.exp %174 : vector<8x128xf32>
    %cst_55 = arith.constant dense<0.000000e+00> : vector<8xf32>
    %176 = vector.multi_reduction <add>, %175, %cst_55 [1] : vector<8x128xf32> to vector<8xf32>
    %177 = vector.shape_cast %176 : vector<8xf32> to vector<8x1xf32>
    %178 = tpu.reciprocal %177 : vector<8x1xf32> -> vector<8x1xf32>
    %179 = vector.broadcast %178 : vector<8x1xf32> to vector<8x128xf32>
    %180 = arith.mulf %175, %179 : vector<8x128xf32>
    %cst_56 = arith.constant dense<0.000000e+00> : vector<8x8xf32>
    %181 = tpu.matmul %180, %162, %cst_56 {dimension_numbers = #tpu.dot_dimension_numbers<[1], [0], [0], [1], [0, 0, 1, 1], [], []>} : vector<8x128xf32>, vector<128x8xf32>, vector<8x8xf32> -> vector<8x8xf32>
    %182 = vector.extract_strided_slice %5 {offsets = [8, 24], sizes = [8, 8], strides = [1, 1]} : vector<16x96xf32> to vector<8x8xf32>
    %183 = vector.extract_strided_slice %5 {offsets = [8, 56], sizes = [8, 8], strides = [1, 1]} : vector<16x96xf32> to vector<8x8xf32>
    %184 = vector.extract_strided_slice %5 {offsets = [8, 88], sizes = [8, 8], strides = [1, 1]} : vector<16x96xf32> to vector<8x8xf32>
    %185 = tpu.concatenate %183, %12 in 0 : vector<8x8xf32>, vector<120x8xf32> -> vector<128x8xf32>
    %186 = tpu.concatenate %184, %12 in 0 : vector<8x8xf32>, vector<120x8xf32> -> vector<128x8xf32>
    %cst_57 = arith.constant dense<0.000000e+00> : vector<8x128xf32>
    %187 = tpu.matmul %182, %185, %cst_57 {dimension_numbers = #tpu.dot_dimension_numbers<[1], [1], [0], [0], [0, 0, 1, 0], [], []>} : vector<8x8xf32>, vector<128x8xf32>, vector<8x128xf32> -> vector<8x128xf32>
    %188 = vector.extract_strided_slice %8 {offsets = [8, 384], sizes = [8, 128], strides = [1, 1]} : vector<16x512xf32> to vector<8x128xf32>
    %c1_i32_58 = arith.constant 1 : i32
    %189 = tpu.dynamic_rotate %188 by %c1_i32_58 dim 1 {stride = 1 : si32, stride_dimension = 0 : si32} : vector<8x128xf32>, i32 -> vector<8x128xf32>
    %190 = arith.addf %187, %189 : vector<8x128xf32>
    %cst_59 = arith.constant 0.353553385 : f32
    %191 = vector.broadcast %cst_59 : f32 to vector<8x128xf32>
    %192 = arith.mulf %190, %191 : vector<8x128xf32>
    %cst_60 = arith.constant -1.000000e+30 : f32
    %193 = vector.broadcast %cst_60 : f32 to vector<8x128xf32>
    %194 = arith.select %11, %192, %193 : vector<8x128xi1>, vector<8x128xf32>
    %cst_61 = arith.constant dense<0xFF800000> : vector<8xf32>
    %195 = vector.multi_reduction <maximumf>, %194, %cst_61 [1] : vector<8x128xf32> to vector<8xf32>
    %196 = vector.shape_cast %195 : vector<8xf32> to vector<8x1xf32>
    %197 = vector.broadcast %196 : vector<8x1xf32> to vector<8x128xf32>
    %198 = arith.subf %194, %197 : vector<8x128xf32>
    %199 = math.exp %198 : vector<8x128xf32>
    %cst_62 = arith.constant dense<0.000000e+00> : vector<8xf32>
    %200 = vector.multi_reduction <add>, %199, %cst_62 [1] : vector<8x128xf32> to vector<8xf32>
    %201 = vector.shape_cast %200 : vector<8xf32> to vector<8x1xf32>
    %202 = tpu.reciprocal %201 : vector<8x1xf32> -> vector<8x1xf32>
    %203 = vector.broadcast %202 : vector<8x1xf32> to vector<8x128xf32>
    %204 = arith.mulf %199, %203 : vector<8x128xf32>
    %cst_63 = arith.constant dense<0.000000e+00> : vector<8x8xf32>
    %205 = tpu.matmul %204, %186, %cst_63 {dimension_numbers = #tpu.dot_dimension_numbers<[1], [0], [0], [1], [0, 0, 1, 1], [], []>} : vector<8x128xf32>, vector<128x8xf32>, vector<8x8xf32> -> vector<8x8xf32>
    %206 = tpu.concatenate %133, %157, %181, %205 in 1 : vector<8x8xf32>, vector<8x8xf32>, vector<8x8xf32>, vector<8x8xf32> -> vector<8x32xf32>
    %207 = tpu.concatenate %109, %206 in 0 : vector<8x32xf32>, vector<8x32xf32> -> vector<16x32xf32>
    %c0_64 = arith.constant 0 : index
    %c0_65 = arith.constant 0 : index
    %208 = vector.load %arg5[%c0_64, %c0_65] : memref<16x32xf32, #tpu.memory_space<vmem>>, vector<16x32xf32>
    tpu.vector_store %arg5[%c0_64, %c0_65], %207 {strides = array<i32>} : memref<16x32xf32, #tpu.memory_space<vmem>>, vector<16x32xf32>,
    return
  }
  func.func @transform_0(%arg0: i32) -> (i32, i32) {
    %c0_i32 = arith.constant 0 : i32
    %c0_i32_0 = arith.constant 0 : i32
    return %arg0, %c0_i32 : i32, i32
  }
  func.func @transform_1(%arg0: i32) -> (i32, i32) {
    %c0_i32 = arith.constant 0 : i32
    %c0_i32_0 = arith.constant 0 : i32
    %c0_i32_1 = arith.constant 0 : i32
    return %c0_i32, %c0_i32_0 : i32, i32
  }
  func.func @transform_2(%arg0: i32) -> (i32, i32) {
    %c0_i32 = arith.constant 0 : i32
    %c0_i32_0 = arith.constant 0 : i32
    %c0_i32_1 = arith.constant 0 : i32
    return %c0_i32, %c0_i32_0 : i32, i32
  }
  func.func @transform_3(%arg0: i32) -> (i32, i32) {
    %c0_i32 = arith.constant 0 : i32
    %c0_i32_0 = arith.constant 0 : i32
    %c0_i32_1 = arith.constant 0 : i32
    return %c0_i32, %c0_i32_0 : i32, i32
  }
  func.func @transform_4(%arg0: i32) -> (i32, i32) {
    %c0_i32 = arith.constant 0 : i32
    %c0_i32_0 = arith.constant 0 : i32
    return %arg0, %c0_i32 : i32, i32
  }
}

</mosaic_0001>

<bundles_post_ra>
// kernel: tpu_custom_call.1
= control target key start
LH: loop header
LB: loop body
LE: loop exit
PB: predicated region body
PF: predicated region fallthrough
CT: control target
= control target key end

     0   :  { %9 = vsyncpa [#allocation3], 0  ;;  %s1867_s0 = inlined_call_operand.hbm [shape: f32[16,32], index: 0, kind: input, shape index: {}]   ;;  %s1868_s1 = inlined_call_operand.hbm [shape: f32[32,96], index: 1, kind: input, shape index: {}]   ;;  %s1869_s2 = inlined_call_operand.vmem [shape: f32[1,96], index: 2, kind: input, shape index: {}]   ;;  %s1870_s3 = inlined_call_operand.hbm [shape: f32[32,512], index: 3, kind: input, shape index: {}]   ;;  %s1871_s4 = inlined_call_operand.hbm [shape: f32[16,32], index: 4, kind: output, shape index: {}]  }
   0x1   :  { %10 = vsyncpa [#allocation6], 0 }
   0x2   :  { %11 = vsyncpa [#allocation4], 0  ;;  %s29_s17 = sshll.u32 %s1868_s1, 4  ;;  %s1244_s18 = smov [#allocation5]   ;;  %s30_s17 = int_to_ptr.hbm [resolvable:$true] %s29_s17 }
   0x3   :  { %s31_s19 = sshll.u32 %s1244_s18, 4  ;;  %s16_s22 = sshll.u32 %s1867_s0, 4  ;;  %s32_s19 = int_to_ptr.vmem [resolvable:$true] %s31_s19  ;;  %s17_s22 = int_to_ptr.hbm [resolvable:$true] %s16_s22 }
   0x4   :  { %s1245_s23 = smov 128   ;;  %s1246_s24 = smov 8  }
   0x5   :  { %37 = dma.hbm_to_vmem [thread:$0]  %s30_s17, 512, %s32_s19, [#allocation6], %s1245_s23, %s1245_s23, %s1246_s24  }
   0x6   :  { %s1247_s25 = smov [#allocation2]   ;;  %s44_s1 = sshll.u32 %s1870_s3, 4  ;;  %s45_s1 = int_to_ptr.hbm [resolvable:$true] %s44_s1 }
   0x7   :  { %s18_s26 = sshll.u32 %s1247_s25, 4  ;;  %s1248_s0 = smov [#allocation7]   ;;  %s19_s26 = int_to_ptr.vmem [resolvable:$true] %s18_s26 }
   0x8   :  { %24 = dma.hbm_to_vmem [thread:$0]  %s17_s22, 256, %s19_s26, [#allocation3], %s1245_s23, %s1245_s23, %s1246_s24  }
   0x9   :  { %s46_s29 = sshll.u32 %s1248_s0, 4  ;;  %s1249_s30 = smov 512   ;;  %s47_s29 = int_to_ptr.vmem [resolvable:$true] %s46_s29 }
   0xa   :  { %s1250_s5 = smov 32  }
   0xb   :  { %52 = dma.hbm_to_vmem [thread:$0]  %s45_s1, 2048, %s47_s29, [#allocation6], %s1249_s30, %s1249_s30, %s1250_s5  }
   0xc   :  { %1238 = dma.done.wait [#allocation3], 256  }
   0xd   :  { %1239 = vsyncadd [#allocation3], 4294967040 }
   0xe   :  { %1240 = dma.done.wait [#allocation6], 2560  }
   0xf   :  { %1241 = vsyncadd [#allocation6], 4294964736  ;;  %v1251_v0 = vmov 0.0   ;;  %s1252_s6 = smov 96   ;;  %v70_v1 = vld [vmem:[#allocation5 + $0x18] sm:$0xff]  ;;  %v69_v2 = vld [vmem:[#allocation5 + $0x10] sm:$0xff]  ;;  %v219_v35 = vlaneseq }
  0x10   :  { %231 = vrot.lane.b32.xlu0 %v1251_v0, %s1252_s6  ;;  %94 = vmatpush.msra.mxu0 %v70_v1  ;;  %v68_v3 = vld [vmem:[#allocation5 + $0x8] sm:$0xff]  ;;  %v119_v5 = vld [vmem:[#allocation7 + $0x70] sm:$0xff]  ;;  %v67_v7 = vld [vmem:[#allocation5] sm:$0xff]  ;;  %vm75_vm0 = vcmask 261120   ;;  %vm233_vm1 = vcmask 64512   ;;  %s1254_s8 = smov 64  }
  0x11   :  { %1082 = vmatpush.msra.mxu1 %v70_v1  ;;  %v118_v4 = vld [vmem:[#allocation7 + $0x68] sm:$0xff]  ;;  %185 = vmatpush.msra.mxu3 %v119_v5  ;;  %v115_v8 = vld [vmem:[#allocation7 + $0x50] sm:$0xff]  ;;  %v66_v10 = vld [vmem:[#allocation2 + $0x8] sm:$0xff]  ;;  %s1255_s9 = smov 112   ;;  %s1256_s10 = smov 257   ;;  %v220_v37 = vshrl.u32 %v219_v35, 7 }
  0x12   :  { %95 = vmatpush.msra.mxu0 %v69_v2  ;;  %v114_v6 = vld [vmem:[#allocation7 + $0x48] sm:$0xff]  ;;  %162 = vmatpush.msra.mxu2 %v118_v4  ;;  %v65_v9 = vld [vmem:[#allocation2] sm:$0xff]  ;;  %v117_v11 = vld [vmem:[#allocation7 + $0x60] sm:$0xff]  ;;  %s1257_s11 = smov 120   ;;  %v222_v38 = vand.u32 127, %v219_v35  ;;  %s1258_s12 = smov 80  }
  0x13   :  { %1083 = vmatpush.msra.mxu1 %v69_v2  ;;  %v120_v12 = vld [vmem:[#allocation7 + $0x78] sm:$0xff]  ;;  %186 = vmatpush.msra.mxu3 %v115_v8  ;;  %v113_v13 = vld [vmem:[#allocation7 + $0x40] sm:$0xff]  ;;  %v110_v16 = vld [vmem:[#allocation7 + $0x28] sm:$0xff]  ;;  %s1259_s13 = smov 56   ;;  %s1260_s14 = smov 72  }
  0x14   :  { %96 = vmatpush.msra.mxu0 %v68_v3  ;;  %163 = vmatpush.msra.mxu2 %v114_v6  ;;  %v116_v14 = vld [vmem:[#allocation7 + $0x58] sm:$0xff]  ;;  %v109_v15 = vld [vmem:[#allocation7 + $0x20] sm:$0xff]  ;;  %v111_v17 = vld [vmem:[#allocation7 + $0x30] sm:$0xff]  ;;  %vm1403_vm2 = vcmp.le.s32.totalorder %v222_v38, %v220_v37  ;;  %s1261_s15 = smov 48   ;;  %s1262_s16 = smov 104  }
  0x15   :  { %1084 = vmatpush.msra.mxu1 %v68_v3  ;;  %v112_v18 = vld [vmem:[#allocation7 + $0x38] sm:$0xff]  ;;  %187 = vmatpush.msra.mxu3 %v111_v17  ;;  %v105_v19 = vld [vmem:[#allocation7] sm:$0xff]  ;;  %v106_v20 = vld [vmem:[#allocation7 + $0x8] sm:$0xff]  ;;  %s1263_s17 = smov 40   ;;  %s1264_s18 = smov 16  }
  0x16   :  { %97 = vmatpush.msra.mxu0 %v67_v7  ;;  %164 = vmatpush.msra.mxu2 %v110_v16  ;;  %v107_v21 = vld [vmem:[#allocation7 + $0x10] sm:$0xff]  ;;  %v108_v22 = vld [vmem:[#allocation7 + $0x18] sm:$0xff]  ;;  %s1265_s19 = smov 24   ;;  %s1266_s20 = smov [#allocation8]  }
  0x17   :  { %1085 = vmatpush.msra.mxu1 %v67_v7  ;;  %936 = vmatmul.msk.f32.vlgmr.msra.gmra.mxu0 %vm75_vm0, %v65_v9  ;;  %v1109_v24 = vld [vmem:[%s1869_s2] ss:$0 sm:$0xff]  ;;  %s1253_s2 = smov 88   ;;  %s920_s21 = sshll.u32 %s1266_s20, 4  ;;  %s921_s21 = int_to_ptr.vmem [resolvable:$true] %s920_s21 }
  0x18   :  { %937 = vmatmul.msk.f32.vlgmr.msra.gmra.mxu1 %vm75_vm0, %v66_v10  ;;  %208 = vmatpush.msrb.mxu0 %v120_v12  ;;  %s922_s26 = sshll.u32 %s1871_s4, 4  ;;  %s923_s26 = int_to_ptr.hbm [resolvable:$true] %s922_s26 }
  0x19   :  { %139 = vmatpush.msrb.mxu1 %v117_v11  ;;  %165 = vmatpush.msra.mxu2 %v106_v20 }
  0x1a   :  { %209 = vmatpush.msrb.mxu0 %v116_v14  ;;  %188 = vmatpush.msra.mxu3 %v107_v21 }
  0x1b   :  { %140 = vmatpush.msrb.mxu1 %v113_v13 }
  0x1c   :  { %210 = vmatpush.msrb.mxu0 %v112_v18 }
  0x1d   :  { %141 = vmatpush.msrb.mxu1 %v109_v15 }
  0x1e   :  { %211 = vmatpush.msrb.mxu0 %v108_v22 }
  0x1f   :  { %142 = vmatpush.msrb.mxu1 %v105_v19 }
  0x82   :  { %v1311_v23 = vpop.permute.xlu0 %231 }
  0x83   :  { %946 = vmatpush.xpose.msk.msra.mxu1 %vm233_vm1, %v1311_v23 }
  0x87   :  { %947 = vmatpush.xpose.msk.msra.mxu1 %vm233_vm1, %v1311_v23 }
  0x8b   :  { %948 = vmatpush.xpose.msk.msra.mxu1 %vm233_vm1, %v1311_v23 }
  0x8f   :  { %949 = vmatpush.xpose.msk.msra.mxu1 %vm233_vm1, %v1311_v23 }
  0x93   :  { %950 = vmatpush.xpose.msk.msra.mxu1 %vm233_vm1, %v1311_v23 }
  0x94   :  { %v99_v25 = vpop.f32.mrf.mxu0 }
  0x95   :  { %v1330_v26 = vadd.f32 %v1109_v24, %v99_v25  ;;  %v102_v27 = vpop.f32.mrf.mxu1 }
  0x96   :  { %v1344_v28 = vadd.f32 %v1109_v24, %v102_v27 }
  0x97   :  { %951 = vmatpush.xpose.msk.msra.mxu1 %vm233_vm1, %v1311_v23  ;;  %229 = vrot.lane.b32.xlu0 %v1330_v26, %s1252_s6 }
  0x98   :  { %938 = vmatmul.msk.f32.vlgmr.msrb.gmra.mxu1 %vm75_vm0, %v1330_v26  ;;  %940 = vmatmul.msk.f32.vlgmr.msra.gmra.mxu2 %vm75_vm0, %v1330_v26 }
  0x99   :  { %942 = vmatmul.msk.f32.vlgmr.msra.gmra.mxu3 %vm75_vm0, %v1330_v26  ;;  %944 = vmatmul.msk.f32.vlgmr.msrb.gmra.mxu0 %vm75_vm0, %v1330_v26 }
  0x9b   :  { %952 = vmatpush.xpose.msk.msra.mxu1 %vm233_vm1, %v1311_v23 }
  0x9f   :  { %953 = vmatpush.xpose.msk.msra.mxu1 %vm233_vm1, %v1311_v23  ;;  %316 = vrot.lane.b32.xlu0 %v1330_v26, %s1253_s2 }
  0xa0   :  { %939 = vmatmul.msk.f32.gmra.mxu1 %vm75_vm0, %v1344_v28  ;;  %941 = vmatmul.msk.f32.gmra.mxu2 %vm75_vm0, %v1344_v28 }
  0xa1   :  { %943 = vmatmul.msk.f32.gmra.mxu3 %vm75_vm0, %v1344_v28  ;;  %945 = vmatmul.msk.f32.gmra.mxu0 %vm75_vm0, %v1344_v28 }
  0xa3   :  { %954 = vmatpush.xpose.msk.msra.mxu1 %vm233_vm1, %v1311_v23 }
  0xa7   :  { %955 = vmatpush.xpose.msk.msra.mxu1 %vm233_vm1, %v1311_v23  ;;  %286 = vrot.lane.b32.xlu0 %v1251_v0, %s1254_s8 }
  0xab   :  { %956 = vmatpush.xpose.msk.msra.mxu1 %vm233_vm1, %v1311_v23 }
  0xaf   :  { %957 = vmatpush.xpose.msk.msra.mxu1 %vm233_vm1, %v1311_v23  ;;  %284 = vrot.lane.b32.xlu0 %v1330_v26, %s1254_s8 }
  0xb3   :  { %958 = vmatpush.xpose.msk.msra.mxu1 %vm233_vm1, %v1311_v23 }
  0xb7   :  { %959 = vmatpush.xpose.msk.msra.mxu1 %vm233_vm1, %v1311_v23  ;;  %400 = vrot.lane.b32.xlu0 %v1330_v26, %s1255_s9 }
  0xbb   :  { %960 = vmatpush.xpose.msk.msra.mxu1 %vm233_vm1, %v1311_v23 }
 0x109   :  { %v230_v29 = vpop.permute.xlu0 %229 }
 0x10a   :  { %961 = vmatpush.xpose.msk.msra.mxu1 %vm233_vm1, %v230_v29 }
 0x10d   :  { %962 = vmatmul.msk.f32.vlgmr.msra.gmra.mxu1 %vm233_vm1, %v1330_v26 }
 0x111   :  { %v317_v30 = vpop.permute.xlu0 %316 }
 0x115   :  { %v144_v31 = vpop.f32.mrf.mxu1 }
 0x116   :  { %226 = vrot.lane.b32.xlu1 %v144_v31, %s1256_s10  ;;  %v213_v60 = vpop.f32.mrf.mxu0 }
 0x119   :  { %v1380_v32 = vpop.permute.xlu0 %286 }
 0x11a   :  { %290 = vmatpush.msrb.mxu2 %v1380_v32 }
 0x11b   :  { %v167_v45 = vpop.f32.mrf.mxu2 }
 0x11c   :  { %291 = vmatpush.msrb.mxu2 %v1380_v32  ;;  %v190_v46 = vpop.f32.mrf.mxu3 }
 0x11d   :  { %v1401_v34 = vpop.f32.mrf.mxu1 }
 0x11e   :  { %318 = vrot.lane.b32.xlu1 %v1251_v0, %s1253_s2  ;;  %292 = vmatpush.msrb.mxu2 %v1380_v32 }
 0x120   :  { %293 = vmatpush.msrb.mxu2 %v1380_v32 }
 0x121   :  { %v285_v33 = vpop.permute.xlu0 %284 }
 0x122   :  { %294 = vmatpush.msrb.mxu2 %v1380_v32 }
 0x123   :  { %v1538_v19 = vpop.f32.mrf.mxu2 }
 0x124   :  { %295 = vmatpush.msrb.mxu2 %v1380_v32  ;;  %v1486_v54 = vpop.f32.mrf.mxu3 }
 0x126   :  { %314 = vrot.lane.b32.xlu1 %v1330_v26, %s1257_s11  ;;  %296 = vmatpush.msrb.mxu2 %v1380_v32 }
 0x128   :  { %297 = vmatpush.msrb.mxu2 %v1380_v32 }
 0x129   :  { %v401_v12 = vpop.permute.xlu0 %400 }
 0x12a   :  { %298 = vmatpush.msrb.mxu2 %v1380_v32 }
 0x12c   :  { %299 = vmatpush.msrb.mxu2 %v1380_v32 }
 0x12e   :  { %300 = vmatpush.msrb.mxu2 %v1380_v32 }
 0x130   :  { %301 = vmatpush.msrb.mxu2 %v1380_v32 }
 0x132   :  { %302 = vmatpush.msrb.mxu2 %v1380_v32 }
 0x134   :  { %303 = vmatpush.msrb.mxu2 %v1380_v32 }
 0x136   :  { %304 = vmatpush.msrb.mxu2 %v1380_v32 }
 0x138   :  { %305 = vmatpush.msrb.mxu2 %v285_v33 }
 0x188   :  { %v227_v36 = vpop.permute.xlu1 %226 }
 0x18a   :  { %v257_v39 = vpop.f32.mrf.mxu1 }
 0x18b   :  { %v258_v40 = vadd.f32 %v257_v39, %v227_v36 }
 0x18d   :  { %v260_v42 = vmul.f32 0.35355338, %v258_v40 }
 0x18f   :  { %v261_v44 = vsel %vm1403_vm2, %v260_v42, -1e+30 }
 0x190   :  { %v1407_v43 = vpop.permute.xlu1 %318  ;;  %262 = vmax.xlane.f32.xlu2 %v261_v44 }
 0x191   :  { %963 = vmatpush.xpose.msk.msrb.mxu3 %vm233_vm1, %v1407_v43 }
 0x195   :  { %964 = vmatpush.xpose.msk.msrb.mxu3 %vm233_vm1, %v1407_v43 }
 0x198   :  { %v315_v47 = vpop.permute.xlu1 %314 }
 0x199   :  { %965 = vmatpush.xpose.msk.msrb.mxu3 %vm233_vm1, %v1407_v43 }
 0x19d   :  { %966 = vmatpush.xpose.msk.msrb.mxu3 %vm233_vm1, %v1407_v43 }
 0x1a1   :  { %967 = vmatpush.xpose.msk.msrb.mxu3 %vm233_vm1, %v1407_v43 }
 0x1a5   :  { %968 = vmatpush.xpose.msk.msrb.mxu3 %vm233_vm1, %v1407_v43 }
 0x1a8   :  { %404 = vrot.lane.b32.xlu2 %v1251_v0, %s1258_s12 }
 0x1a9   :  { %969 = vmatpush.xpose.msk.msrb.mxu3 %vm233_vm1, %v1407_v43 }
 0x1ad   :  { %970 = vmatpush.xpose.msk.msrb.mxu3 %vm233_vm1, %v1407_v43 }
 0x1b0   :  { %402 = vrot.lane.b32.xlu2 %v1330_v26, %s1258_s12 }
 0x1b1   :  { %971 = vmatpush.xpose.msk.msrb.mxu3 %vm233_vm1, %v1407_v43 }
 0x1b5   :  { %972 = vmatpush.xpose.msk.msrb.mxu3 %vm233_vm1, %v1407_v43 }
 0x1b8   :  { %312 = vrot.lane.b32.xlu2 %v167_v45, %s1256_s10 }
 0x1b9   :  { %973 = vmatpush.xpose.msk.msrb.mxu3 %vm233_vm1, %v1407_v43 }
 0x1bd   :  { %974 = vmatpush.xpose.msk.msrb.mxu3 %vm233_vm1, %v1407_v43 }
 0x1c0   :  { %398 = vrot.lane.b32.xlu2 %v190_v46, %s1256_s10 }
 0x1c1   :  { %975 = vmatpush.xpose.msk.msrb.mxu3 %vm233_vm1, %v1407_v43 }
 0x1c5   :  { %976 = vmatpush.xpose.msk.msrb.mxu3 %vm233_vm1, %v1407_v43 }
 0x1c8   :  { %372 = vrot.lane.b32.xlu2 %v1251_v0, %s1259_s13 }
 0x1c9   :  { %977 = vmatpush.xpose.msk.msrb.mxu3 %vm233_vm1, %v1407_v43 }
 0x1cd   :  { %978 = vmatpush.xpose.msk.msrb.mxu3 %vm233_vm1, %v317_v30 }
 0x1d0   :  { %979 = vmatmul.msk.f32.vlgmr.msrb.gmra.mxu3 %vm233_vm1, %v315_v47 }
 0x203   :  { %v263_v48 = vpop.xlane.xlu2 %262 }
 0x204   :  { %v264_v49 = vsub.f32 %v261_v44, %v263_v48 }
 0x206   :  { %v265_v50 = vmul.f32 1.442695, %v264_v49 }
 0x208   :  { %1110 = vpow2.f32 %v265_v50 }
 0x20b   :  { %v1451_v51 = vpop.permute.xlu2 %404 }
 0x20c   :  { %980 = vmatpush.xpose.msk.msra.mxu2 %vm233_vm1, %v1451_v51 }
 0x20e   :  { %v1111_v52 = vpop.eup %1110 }
 0x20f   :  { %267 = vadd.xlane.f32.xlu1 %v1111_v52 }
 0x210   :  { %981 = vmatpush.xpose.msk.msra.mxu2 %vm233_vm1, %v1451_v51 }
 0x213   :  { %v403_v53 = vpop.permute.xlu2 %402 }
 0x214   :  { %982 = vmatpush.xpose.msk.msra.mxu2 %vm233_vm1, %v1451_v51 }
 0x218   :  { %983 = vmatpush.xpose.msk.msra.mxu2 %vm233_vm1, %v1451_v51 }
 0x21b   :  { %v313_v55 = vpop.permute.xlu2 %312 }
 0x21c   :  { %984 = vmatpush.xpose.msk.msra.mxu2 %vm233_vm1, %v1451_v51 }
 0x220   :  { %985 = vmatpush.xpose.msk.msra.mxu2 %vm233_vm1, %v1451_v51 }
 0x223   :  { %v1495_v1 = vpop.permute.xlu2 %398 }
 0x224   :  { %986 = vmatpush.xpose.msk.msra.mxu2 %vm233_vm1, %v1451_v51 }
 0x228   :  { %987 = vmatpush.xpose.msk.msra.mxu2 %vm233_vm1, %v1451_v51  ;;  %490 = vrot.lane.b32.xlu1 %v1251_v0, %s1260_s14 }
 0x22b   :  { %v1497_v10 = vpop.permute.xlu2 %372 }
 0x22c   :  { %988 = vmatpush.xpose.msk.msra.mxu2 %vm233_vm1, %v1451_v51  ;;  %376 = vmatpush.msra.mxu0 %v1497_v10 }
 0x22e   :  { %377 = vmatpush.msra.mxu0 %v1497_v10 }
 0x230   :  { %989 = vmatpush.xpose.msk.msra.mxu2 %vm233_vm1, %v1451_v51  ;;  %378 = vmatpush.msra.mxu0 %v1497_v10 }
 0x232   :  { %379 = vmatpush.msra.mxu0 %v1497_v10 }
 0x234   :  { %990 = vmatpush.xpose.msk.msra.mxu2 %vm233_vm1, %v1451_v51  ;;  %380 = vmatpush.msra.mxu0 %v1497_v10 }
 0x236   :  { %381 = vmatpush.msra.mxu0 %v1497_v10 }
 0x238   :  { %991 = vmatpush.xpose.msk.msra.mxu2 %vm233_vm1, %v1451_v51  ;;  %382 = vmatpush.msra.mxu0 %v1497_v10 }
 0x23a   :  { %383 = vmatpush.msra.mxu0 %v1497_v10 }
 0x23c   :  { %992 = vmatpush.xpose.msk.msra.mxu2 %vm233_vm1, %v1451_v51  ;;  %384 = vmatpush.msra.mxu0 %v1497_v10 }
 0x23e   :  { %385 = vmatpush.msra.mxu0 %v1497_v10 }
 0x240   :  { %993 = vmatpush.xpose.msk.msra.mxu2 %vm233_vm1, %v1451_v51  ;;  %386 = vmatpush.msra.mxu0 %v1497_v10 }
 0x242   :  { %387 = vmatpush.msra.mxu0 %v1497_v10 }
 0x244   :  { %994 = vmatpush.xpose.msk.msra.mxu2 %vm233_vm1, %v1451_v51  ;;  %388 = vmatpush.msra.mxu0 %v1497_v10 }
 0x246   :  { %389 = vmatpush.msra.mxu0 %v1497_v10 }
 0x248   :  { %995 = vmatpush.xpose.msk.msra.mxu2 %vm233_vm1, %v403_v53  ;;  %390 = vmatpush.msra.mxu0 %v1497_v10 }
 0x253   :  { %v343_v56 = vpop.f32.mrf.mxu3 }
 0x254   :  { %v344_v57 = vadd.f32 %v343_v56, %v313_v55 }
 0x256   :  { %v346_v58 = vmul.f32 0.35355338, %v344_v57 }
 0x258   :  { %v347_v59 = vsel %vm1403_vm2, %v346_v58, -1e+30 }
 0x259   :  { %348 = vmax.xlane.f32.xlu0 %v347_v59 }
 0x26d   :  { %370 = vrot.lane.b32.xlu0 %v1330_v26, %s1259_s13 }
 0x275   :  { %456 = vrot.lane.b32.xlu0 %v1330_v26, %s1261_s15 }
 0x27d   :  { %484 = vrot.lane.b32.xlu0 %v213_v60, %s1256_s10 }
 0x282   :  { %v268_v61 = vpop.xlane.xlu1 %267 }
 0x283   :  { %1112 = vrcp.f32 %v268_v61  ;;  %v280_v3 = vand.u32 2147483648, %v268_v61  ;;  %v278_v5 = vand.u32 2147483647, %v268_v61  ;;  %vm274_vm4 = vweird.f32 %v268_v61 }
 0x285   :  { %v281_v7 = vor.u32 1.1754944e-38, %v280_v3  ;;  %vm279_vm6 = vcmp.eq.f32.partialorder %v278_v5, 8.507059e+37 }
 0x289   :  { %v1113_v62 = vpop.eup %1112 }
 0x28a   :  { %v270_v63 = vmul.f32 %v1113_v62, %v268_v61  ;;  %vm275_vm3 = vweird.f32 %v1113_v62 }
 0x28b   :  { %vm276_vm5 = vmor %vm274_vm4, %vm275_vm3 }
 0x28c   :  { %v271_v2 = vsub.f32 1.0, %v270_v63 }
 0x28e   :  { %v272_v4 = vmul.f32 %v1113_v62, %v271_v2 }
 0x290   :  { %v273_v6 = vadd.f32 %v1113_v62, %v272_v4 }
 0x292   :  { %v277_v8 = vsel %vm276_vm5, %v1113_v62, %v273_v6 }
 0x293   :  { %v282_v9 = vsel %vm279_vm6, %v281_v7, %v277_v8 }
 0x294   :  { %v283_v11 = vmul.f32 %v1111_v52, %v282_v9 }
 0x296   :  { %306 = vmatmul.f32.vlgmr.msrb.gmra.mxu2 %v283_v11 }
 0x297   :  { %642 = vmatpush.msrb.mxu2 %v1380_v32 }
 0x299   :  { %643 = vmatpush.msrb.mxu2 %v1380_v32 }
 0x29a   :  { %v1530_v18 = vpop.permute.xlu1 %490 }
 0x29b   :  { %644 = vmatpush.msrb.mxu2 %v1380_v32  ;;  %997 = vmatpush.xpose.msk.msrb.mxu1 %vm233_vm1, %v1530_v18 }
 0x29d   :  { %645 = vmatpush.msrb.mxu2 %v1380_v32 }
 0x29e   :  { %996 = vmatmul.msk.f32.vlgmr.msra.gmra.mxu2 %vm233_vm1, %v401_v12 }
 0x29f   :  { %646 = vmatpush.msrb.mxu2 %v1380_v32  ;;  %998 = vmatpush.xpose.msk.msrb.mxu1 %vm233_vm1, %v1530_v18 }
 0x2a1   :  { %647 = vmatpush.msrb.mxu2 %v1380_v32 }
 0x2a3   :  { %648 = vmatpush.msrb.mxu2 %v1380_v32  ;;  %999 = vmatpush.xpose.msk.msrb.mxu1 %vm233_vm1, %v1530_v18 }
 0x2a5   :  { %649 = vmatpush.msrb.mxu2 %v1380_v32 }
 0x2a7   :  { %650 = vmatpush.msrb.mxu2 %v1380_v32  ;;  %1000 = vmatpush.xpose.msk.msrb.mxu1 %vm233_vm1, %v1530_v18 }
 0x2a9   :  { %651 = vmatpush.msrb.mxu2 %v1380_v32 }
 0x2ab   :  { %652 = vmatpush.msrb.mxu2 %v1380_v32  ;;  %1001 = vmatpush.xpose.msk.msrb.mxu1 %vm233_vm1, %v1530_v18 }
 0x2ad   :  { %653 = vmatpush.msrb.mxu2 %v1380_v32 }
 0x2af   :  { %654 = vmatpush.msrb.mxu2 %v1380_v32  ;;  %1002 = vmatpush.xpose.msk.msrb.mxu1 %vm233_vm1, %v1530_v18 }
 0x2b1   :  { %655 = vmatpush.msrb.mxu2 %v1380_v32 }
 0x2b3   :  { %656 = vmatpush.msrb.mxu2 %v1380_v32  ;;  %1003 = vmatpush.xpose.msk.msrb.mxu1 %vm233_vm1, %v1530_v18 }
 0x2b7   :  { %1004 = vmatpush.xpose.msk.msrb.mxu1 %vm233_vm1, %v1530_v18 }
 0x2bb   :  { %1005 = vmatpush.xpose.msk.msrb.mxu1 %vm233_vm1, %v1530_v18 }
 0x2bf   :  { %1006 = vmatpush.xpose.msk.msrb.mxu1 %vm233_vm1, %v1530_v18 }
 0x2c3   :  { %1007 = vmatpush.xpose.msk.msrb.mxu1 %vm233_vm1, %v1530_v18 }
 0x2c7   :  { %1008 = vmatpush.xpose.msk.msrb.mxu1 %vm233_vm1, %v1530_v18 }
 0x2cb   :  { %1009 = vmatpush.xpose.msk.msrb.mxu1 %vm233_vm1, %v1530_v18 }
 0x2cc   :  { %v349_v13 = vpop.xlane.xlu0 %348 }
 0x2cd   :  { %v350_v14 = vsub.f32 %v347_v59, %v349_v13 }
 0x2cf   :  { %v351_v15 = vmul.f32 1.442695, %v350_v14  ;;  %1010 = vmatpush.xpose.msk.msrb.mxu1 %vm233_vm1, %v1530_v18 }
 0x2d1   :  { %1114 = vpow2.f32 %v351_v15 }
 0x2d3   :  { %1011 = vmatpush.xpose.msk.msrb.mxu1 %vm233_vm1, %v1530_v18 }
 0x2d7   :  { %v1115_v16 = vpop.eup %1114 }
 0x2d8   :  { %353 = vadd.xlane.f32.xlu2 %v1115_v16 }
 0x2df   :  { %v371_v17 = vpop.permute.xlu0 %370 }
 0x2e0   :  { %391 = vmatpush.msra.mxu0 %v371_v17 }
 0x2e7   :  { %v457_v48 = vpop.permute.xlu0 %456 }
 0x2ef   :  { %v485_v2 = vpop.permute.xlu0 %484 }
 0x319   :  { %v1544_v20 = vpop.f32.mrf.mxu2 }
 0x321   :  { %v429_v21 = vpop.f32.mrf.mxu2 }
 0x322   :  { %v430_v22 = vadd.f32 %v429_v21, %v1495_v1  ;;  %v216_v1 = vpop.f32.mrf.mxu0 }
 0x324   :  { %v432_v24 = vmul.f32 0.35355338, %v430_v22 }
 0x326   :  { %v433_v25 = vsel %vm1403_vm2, %v432_v24, -1e+30 }
 0x327   :  { %434 = vmax.xlane.f32.xlu1 %v433_v25 }
 0x340   :  { %458 = vrot.lane.b32.xlu1 %v1251_v0, %s1261_s15 }
 0x348   :  { %488 = vrot.lane.b32.xlu1 %v1330_v26, %s1260_s14 }
 0x34b   :  { %v354_v27 = vpop.xlane.xlu2 %353 }
 0x34c   :  { %1116 = vrcp.f32 %v354_v27  ;;  %v366_v32 = vand.u32 2147483648, %v354_v27  ;;  %v364_v35 = vand.u32 2147483647, %v354_v27  ;;  %vm360_vm8 = vweird.f32 %v354_v27 }
 0x34e   :  { %v367_v37 = vor.u32 1.1754944e-38, %v366_v32  ;;  %vm365_vm10 = vcmp.eq.f32.partialorder %v364_v35, 8.507059e+37 }
 0x350   :  { %589 = vrot.lane.b32.xlu1 %v1344_v28, %s1252_s6 }
 0x352   :  { %v1117_v29 = vpop.eup %1116 }
 0x353   :  { %v356_v30 = vmul.f32 %v1117_v29, %v354_v27  ;;  %vm361_vm7 = vweird.f32 %v1117_v29 }
 0x354   :  { %vm362_vm9 = vmor %vm360_vm8, %vm361_vm7 }
 0x355   :  { %v357_v31 = vsub.f32 1.0, %v356_v30 }
 0x357   :  { %v358_v33 = vmul.f32 %v1117_v29, %v357_v31 }
 0x358   :  { %587 = vrot.lane.b32.xlu1 %v1401_v34, %s1256_s10 }
 0x359   :  { %v359_v36 = vadd.f32 %v1117_v29, %v358_v33 }
 0x35b   :  { %v363_v38 = vsel %vm362_vm9, %v1117_v29, %v359_v36 }
 0x35c   :  { %v368_v39 = vsel %vm365_vm10, %v367_v37, %v363_v38 }
 0x35d   :  { %v369_v40 = vmul.f32 %v1115_v16, %v368_v39 }
 0x35f   :  { %392 = vmatmul.f32.vlgmr.msra.gmra.mxu0 %v369_v40 }
 0x39a   :  { %v435_v42 = vpop.xlane.xlu1 %434 }
 0x39b   :  { %v436_v44 = vsub.f32 %v433_v25, %v435_v42 }
 0x39d   :  { %v437_v45 = vmul.f32 1.442695, %v436_v44 }
 0x39f   :  { %1118 = vpow2.f32 %v437_v45 }
 0x3a5   :  { %v1577_v46 = vpop.eup %1118 }
 0x3a6   :  { %439 = vadd.xlane.f32.xlu2 %v1577_v46 }
 0x3b2   :  { %v1580_v47 = vpop.permute.xlu1 %458 }
 0x3b3   :  { %462 = vmatpush.msrb.mxu0 %v1580_v47 }
 0x3b5   :  { %463 = vmatpush.msrb.mxu0 %v1580_v47 }
 0x3b7   :  { %464 = vmatpush.msrb.mxu0 %v1580_v47 }
 0x3b9   :  { %465 = vmatpush.msrb.mxu0 %v1580_v47 }
 0x3ba   :  { %v489_v34 = vpop.permute.xlu1 %488 }
 0x3bb   :  { %466 = vmatpush.msrb.mxu0 %v1580_v47  ;;  %1012 = vmatpush.xpose.msk.msrb.mxu1 %vm233_vm1, %v489_v34 }
 0x3bd   :  { %467 = vmatpush.msrb.mxu0 %v1580_v47 }
 0x3be   :  { %486 = vrot.lane.b32.xlu2 %v1330_v26, %s1262_s16 }
 0x3bf   :  { %1065 = vmatpush.xpose.msk.msra.mxu1 %vm233_vm1, %v1530_v18  ;;  %468 = vmatpush.msrb.mxu0 %v1580_v47 }
 0x3c1   :  { %469 = vmatpush.msrb.mxu0 %v1580_v47 }
 0x3c2   :  { %v590_v49 = vpop.permute.xlu1 %589 }
 0x3c3   :  { %1066 = vmatpush.xpose.msk.msra.mxu1 %vm233_vm1, %v1530_v18  ;;  %470 = vmatpush.msrb.mxu0 %v1580_v47 }
 0x3c5   :  { %471 = vmatpush.msrb.mxu0 %v1580_v47 }
 0x3c6   :  { %544 = vrot.lane.b32.xlu2 %v1251_v0, %s1263_s17 }
 0x3c7   :  { %1067 = vmatpush.xpose.msk.msra.mxu1 %vm233_vm1, %v1530_v18  ;;  %472 = vmatpush.msrb.mxu0 %v1580_v47 }
 0x3c9   :  { %473 = vmatpush.msrb.mxu0 %v1580_v47 }
 0x3ca   :  { %v588_v8 = vpop.permute.xlu1 %587 }
 0x3cb   :  { %1068 = vmatpush.xpose.msk.msra.mxu1 %vm233_vm1, %v1530_v18  ;;  %474 = vmatpush.msrb.mxu0 %v1580_v47 }
 0x3cd   :  { %475 = vmatpush.msrb.mxu0 %v1580_v47 }
 0x3cf   :  { %1069 = vmatpush.xpose.msk.msra.mxu1 %vm233_vm1, %v1530_v18  ;;  %476 = vmatpush.msrb.mxu0 %v1580_v47 }
 0x3d1   :  { %477 = vmatpush.msrb.mxu0 %v457_v48 }
 0x3d3   :  { %1070 = vmatpush.xpose.msk.msra.mxu1 %vm233_vm1, %v1530_v18  ;;  %1014 = vmatpush.xpose.msk.msra.mxu0 %vm233_vm1, %v1311_v23 }
 0x3d7   :  { %1071 = vmatpush.xpose.msk.msra.mxu1 %vm233_vm1, %v1530_v18  ;;  %1015 = vmatpush.xpose.msk.msra.mxu0 %vm233_vm1, %v1311_v23 }
 0x3db   :  { %1072 = vmatpush.xpose.msk.msra.mxu1 %vm233_vm1, %v1530_v18  ;;  %1016 = vmatpush.xpose.msk.msra.mxu0 %vm233_vm1, %v1311_v23 }
 0x3dc   :  { %v1682_v5 = vpop.f32.mrf.mxu0 }
 0x3df   :  { %1073 = vmatpush.xpose.msk.msra.mxu1 %vm233_vm1, %v1530_v18  ;;  %1017 = vmatpush.xpose.msk.msra.mxu0 %vm233_vm1, %v1311_v23 }
 0x3e3   :  { %1074 = vmatpush.xpose.msk.msra.mxu1 %vm233_vm1, %v1530_v18  ;;  %1018 = vmatpush.xpose.msk.msra.mxu0 %vm233_vm1, %v1311_v23 }
 0x3e7   :  { %1075 = vmatpush.xpose.msk.msra.mxu1 %vm233_vm1, %v1530_v18  ;;  %1019 = vmatpush.xpose.msk.msra.mxu0 %vm233_vm1, %v1311_v23 }
 0x3eb   :  { %1076 = vmatpush.xpose.msk.msra.mxu1 %vm233_vm1, %v1530_v18  ;;  %1020 = vmatpush.xpose.msk.msra.mxu0 %vm233_vm1, %v1311_v23 }
 0x3ef   :  { %1077 = vmatpush.xpose.msk.msra.mxu1 %vm233_vm1, %v1530_v18  ;;  %1021 = vmatpush.xpose.msk.msra.mxu0 %vm233_vm1, %v1311_v23 }
 0x3f3   :  { %1078 = vmatpush.xpose.msk.msra.mxu1 %vm233_vm1, %v1530_v18  ;;  %1022 = vmatpush.xpose.msk.msra.mxu0 %vm233_vm1, %v1311_v23 }
 0x3f7   :  { %1079 = vmatpush.xpose.msk.msra.mxu1 %vm233_vm1, %v1530_v18  ;;  %1023 = vmatpush.xpose.msk.msra.mxu0 %vm233_vm1, %v1311_v23 }
 0x3fb   :  { %1024 = vmatpush.xpose.msk.msra.mxu0 %vm233_vm1, %v1311_v23 }
 0x3ff   :  { %1025 = vmatpush.xpose.msk.msra.mxu0 %vm233_vm1, %v1311_v23 }
 0x403   :  { %1026 = vmatpush.xpose.msk.msra.mxu0 %vm233_vm1, %v1311_v23 }
 0x407   :  { %1027 = vmatpush.xpose.msk.msra.mxu0 %vm233_vm1, %v1311_v23 }
 0x40b   :  { %1028 = vmatpush.xpose.msk.msra.mxu0 %vm233_vm1, %v1311_v23 }
 0x40f   :  { %1029 = vmatpush.xpose.msk.msra.mxu0 %vm233_vm1, %v590_v49 }
 0x419   :  { %v440_v50 = vpop.xlane.xlu2 %439 }
 0x41a   :  { %1120 = vrcp.f32 %v440_v50  ;;  %v452_v57 = vand.u32 2147483648, %v440_v50  ;;  %v450_v59 = vand.u32 2147483647, %v440_v50  ;;  %vm446_vm12 = vweird.f32 %v440_v50 }
 0x41c   :  { %v453_v61 = vor.u32 1.1754944e-38, %v452_v57  ;;  %vm451_vm14 = vcmp.eq.f32.partialorder %v450_v59, 8.507059e+37 }
 0x420   :  { %v1121_v52 = vpop.eup %1120 }
 0x421   :  { %v442_v53 = vmul.f32 %v1121_v52, %v440_v50  ;;  %v487_v55 = vpop.permute.xlu2 %486  ;;  %vm447_vm11 = vweird.f32 %v1121_v52 }
 0x422   :  { %1013 = vmatmul.msk.f32.vlgmr.msrb.gmra.mxu1 %vm233_vm1, %v487_v55  ;;  %vm448_vm13 = vmor %vm446_vm12, %vm447_vm11 }
 0x423   :  { %v443_v56 = vsub.f32 1.0, %v442_v53 }
 0x425   :  { %v444_v58 = vmul.f32 %v1121_v52, %v443_v56 }
 0x427   :  { %v445_v60 = vadd.f32 %v1121_v52, %v444_v58 }
 0x429   :  { %v449_v23 = vsel %vm448_vm13, %v1121_v52, %v445_v60  ;;  %v1701_v13 = vpop.permute.xlu2 %544 }
 0x42a   :  { %v454_v62 = vsel %vm451_vm14, %v453_v61, %v449_v23  ;;  %548 = vmatpush.msra.mxu3 %v1701_v13 }
 0x42b   :  { %v455_v63 = vmul.f32 %v1577_v46, %v454_v62 }
 0x42c   :  { %549 = vmatpush.msra.mxu3 %v1701_v13 }
 0x42d   :  { %478 = vmatmul.f32.vlgmr.msrb.gmra.mxu0 %v455_v63 }
 0x42e   :  { %721 = vmatpush.msrb.mxu0 %v1497_v10  ;;  %550 = vmatpush.msra.mxu3 %v1701_v13 }
 0x430   :  { %722 = vmatpush.msrb.mxu0 %v1497_v10  ;;  %551 = vmatpush.msra.mxu3 %v1701_v13 }
 0x432   :  { %723 = vmatpush.msrb.mxu0 %v1497_v10  ;;  %552 = vmatpush.msra.mxu3 %v1701_v13 }
 0x434   :  { %724 = vmatpush.msrb.mxu0 %v1497_v10  ;;  %553 = vmatpush.msra.mxu3 %v1701_v13 }
 0x435   :  { %1030 = vmatmul.msk.f32.vlgmr.msra.gmra.mxu0 %vm233_vm1, %v1344_v28 }
 0x436   :  { %725 = vmatpush.msrb.mxu0 %v1497_v10  ;;  %554 = vmatpush.msra.mxu3 %v1701_v13 }
 0x438   :  { %726 = vmatpush.msrb.mxu0 %v1497_v10  ;;  %555 = vmatpush.msra.mxu3 %v1701_v13 }
 0x43a   :  { %727 = vmatpush.msrb.mxu0 %v1497_v10  ;;  %556 = vmatpush.msra.mxu3 %v1701_v13 }
 0x43c   :  { %728 = vmatpush.msrb.mxu0 %v1497_v10  ;;  %557 = vmatpush.msra.mxu3 %v1701_v13 }
 0x43e   :  { %729 = vmatpush.msrb.mxu0 %v1497_v10  ;;  %558 = vmatpush.msra.mxu3 %v1701_v13 }
 0x440   :  { %730 = vmatpush.msrb.mxu0 %v1497_v10  ;;  %559 = vmatpush.msra.mxu3 %v1701_v13 }
 0x442   :  { %731 = vmatpush.msrb.mxu0 %v1497_v10  ;;  %560 = vmatpush.msra.mxu3 %v1701_v13 }
 0x444   :  { %732 = vmatpush.msrb.mxu0 %v1497_v10  ;;  %561 = vmatpush.msra.mxu3 %v1701_v13 }
 0x446   :  { %733 = vmatpush.msrb.mxu0 %v1497_v10  ;;  %562 = vmatpush.msra.mxu3 %v1701_v13 }
 0x448   :  { %734 = vmatpush.msrb.mxu0 %v1497_v10 }
 0x44a   :  { %735 = vmatpush.msrb.mxu0 %v1497_v10 }
 0x49f   :  { %v515_v3 = vpop.f32.mrf.mxu1 }
 0x4a0   :  { %v516_v4 = vadd.f32 %v515_v3, %v485_v2 }
 0x4a2   :  { %v518_v6 = vmul.f32 0.35355338, %v516_v4 }
 0x4a4   :  { %v519_v7 = vsel %vm1403_vm2, %v518_v6, -1e+30 }
 0x4a5   :  { %520 = vmax.xlane.f32.xlu0 %v519_v7 }
 0x4aa   :  { %v1686_v0 = vpop.f32.mrf.mxu0 }
 0x4b2   :  { %v612_v9 = vpop.f32.mrf.mxu0 }
 0x4b3   :  { %v613_v11 = vadd.f32 %v612_v9, %v588_v8 }
 0x4b5   :  { %v615_v12 = vmul.f32 0.35355338, %v613_v11 }
 0x4b7   :  { %v616_v10 = vsel %vm1403_vm2, %v615_v12, -1e+30 }
 0x4b8   :  { %617 = vmax.xlane.f32.xlu1 %v616_v10 }
 0x4b9   :  { %668 = vrot.lane.b32.xlu0 %v1344_v28, %s1253_s2 }
 0x4c1   :  { %666 = vrot.lane.b32.xlu0 %v1344_v28, %s1257_s11 }
 0x4d1   :  { %542 = vrot.lane.b32.xlu1 %v1330_v26, %s1263_s17 }
 0x4d9   :  { %747 = vrot.lane.b32.xlu1 %v1344_v28, %s1258_s12 }
 0x4e1   :  { %745 = vrot.lane.b32.xlu1 %v1344_v28, %s1255_s9 }
 0x4e9   :  { %822 = vrot.lane.b32.xlu1 %v216_v1, %s1256_s10 }
 0x518   :  { %v521_v26 = vpop.xlane.xlu0 %520 }
 0x519   :  { %v522_v14 = vsub.f32 %v519_v7, %v521_v26 }
 0x51b   :  { %v523_v15 = vmul.f32 1.442695, %v522_v14 }
 0x51d   :  { %1122 = vpow2.f32 %v523_v15 }
 0x523   :  { %v1123_v16 = vpop.eup %1122 }
 0x524   :  { %525 = vadd.xlane.f32.xlu2 %v1123_v16 }
 0x52b   :  { %v618_v17 = vpop.xlane.xlu1 %617 }
 0x52c   :  { %v619_v18 = vsub.f32 %v616_v10, %v618_v17 }
 0x52e   :  { %v620_v21 = vmul.f32 1.442695, %v619_v18 }
 0x530   :  { %1124 = vpow2.f32 %v620_v21 }
 0x536   :  { %v1718_v22 = vpop.eup %1124 }
 0x537   :  { %622 = vadd.xlane.f32.xlu0 %v1718_v22 }
 0x53c   :  { %639 = vrot.lane.b32.xlu2 %v1344_v28, %s1254_s8 }
 0x543   :  { %v543_v24 = vpop.permute.xlu1 %542 }
 0x544   :  { %824 = vrot.lane.b32.xlu2 %v1344_v28, %s1262_s16  ;;  %563 = vmatpush.msra.mxu3 %v543_v24 }
 0x546   :  { %1031 = vmatpush.xpose.msk.msrb.mxu3 %vm233_vm1, %v1407_v43 }
 0x54a   :  { %1032 = vmatpush.xpose.msk.msrb.mxu3 %vm233_vm1, %v1407_v43 }
 0x54b   :  { %826 = vrot.lane.b32.xlu0 %v1344_v28, %s1260_s14  ;;  %v748_v58 = vpop.permute.xlu1 %747 }
 0x54c   :  { %743 = vrot.lane.b32.xlu2 %v1486_v54, %s1256_s10  ;;  %v669_v54 = vpop.permute.xlu0 %668 }
 0x54e   :  { %1033 = vmatpush.xpose.msk.msrb.mxu3 %vm233_vm1, %v1407_v43 }
 0x552   :  { %1034 = vmatpush.xpose.msk.msrb.mxu3 %vm233_vm1, %v1407_v43 }
 0x553   :  { %664 = vrot.lane.b32.xlu0 %v1538_v19, %s1256_s10  ;;  %v746_v59 = vpop.permute.xlu1 %745 }
 0x554   :  { %v667_v31 = vpop.permute.xlu0 %666 }
 0x556   :  { %1035 = vmatpush.xpose.msk.msrb.mxu3 %vm233_vm1, %v1407_v43 }
 0x55a   :  { %1036 = vmatpush.xpose.msk.msrb.mxu3 %vm233_vm1, %v1407_v43 }
 0x55b   :  { %v823_v2 = vpop.permute.xlu1 %822 }
 0x55e   :  { %1037 = vmatpush.xpose.msk.msrb.mxu3 %vm233_vm1, %v1407_v43 }
 0x562   :  { %1038 = vmatpush.xpose.msk.msrb.mxu3 %vm233_vm1, %v1407_v43 }
 0x566   :  { %1039 = vmatpush.xpose.msk.msrb.mxu3 %vm233_vm1, %v1407_v43 }
 0x56a   :  { %1040 = vmatpush.xpose.msk.msrb.mxu3 %vm233_vm1, %v1407_v43 }
 0x56e   :  { %1041 = vmatpush.xpose.msk.msrb.mxu3 %vm233_vm1, %v1407_v43 }
 0x572   :  { %1042 = vmatpush.xpose.msk.msrb.mxu3 %vm233_vm1, %v1407_v43 }
 0x576   :  { %1043 = vmatpush.xpose.msk.msrb.mxu3 %vm233_vm1, %v1407_v43 }
 0x57a   :  { %1044 = vmatpush.xpose.msk.msrb.mxu3 %vm233_vm1, %v1407_v43 }
 0x57e   :  { %1045 = vmatpush.xpose.msk.msrb.mxu3 %vm233_vm1, %v1407_v43 }
 0x582   :  { %1046 = vmatpush.xpose.msk.msrb.mxu3 %vm233_vm1, %v669_v54 }
 0x597   :  { %v526_v19 = vpop.xlane.xlu2 %525 }
 0x598   :  { %1126 = vrcp.f32 %v526_v19  ;;  %v538_v32 = vand.u32 2147483648, %v526_v19  ;;  %v536_v35 = vand.u32 2147483647, %v526_v19  ;;  %vm532_vm3 = vweird.f32 %v526_v19 }
 0x59a   :  { %v539_v43 = vor.u32 1.1754944e-38, %v538_v32  ;;  %vm537_vm5 = vcmp.eq.f32.partialorder %v536_v35, 8.507059e+37 }
 0x59e   :  { %v1127_v25 = vpop.eup %1126 }
 0x59f   :  { %v528_v27 = vmul.f32 %v1127_v25, %v526_v19  ;;  %v640_v29 = vpop.permute.xlu2 %639  ;;  %vm533_vm15 = vweird.f32 %v1127_v25 }
 0x5a0   :  { %657 = vmatpush.msrb.mxu2 %v640_v29  ;;  %vm534_vm4 = vmor %vm532_vm3, %vm533_vm15 }
 0x5a1   :  { %v529_v30 = vsub.f32 1.0, %v528_v27 }
 0x5a2   :  { %1048 = vmatpush.xpose.msk.msra.mxu2 %vm233_vm1, %v1451_v51 }
 0x5a3   :  { %v530_v33 = vmul.f32 %v1127_v25, %v529_v30 }
 0x5a5   :  { %v531_v36 = vadd.f32 %v1127_v25, %v530_v33 }
 0x5a6   :  { %1049 = vmatpush.xpose.msk.msra.mxu2 %vm233_vm1, %v1451_v51 }
 0x5a7   :  { %v535_v37 = vsel %vm534_vm4, %v1127_v25, %v531_v36  ;;  %v825_v57 = vpop.permute.xlu2 %824 }
 0x5a8   :  { %v540_v38 = vsel %vm537_vm5, %v539_v43, %v535_v37 }
 0x5a9   :  { %v541_v39 = vmul.f32 %v1123_v16, %v540_v38 }
 0x5aa   :  { %1050 = vmatpush.xpose.msk.msra.mxu2 %vm233_vm1, %v1451_v51  ;;  %v623_v40 = vpop.xlane.xlu0 %622 }
 0x5ab   :  { %1128 = vrcp.f32 %v623_v40  ;;  %564 = vmatmul.f32.vlgmr.msra.gmra.mxu3 %v541_v39  ;;  %v635_v46 = vand.u32 2147483648, %v623_v40  ;;  %v633_v48 = vand.u32 2147483647, %v623_v40  ;;  %vm629_vm7 = vweird.f32 %v623_v40 }
 0x5ac   :  { %879 = vmatpush.msra.mxu3 %v1701_v13 }
 0x5ad   :  { %v636_v50 = vor.u32 1.1754944e-38, %v635_v46  ;;  %vm634_vm9 = vcmp.eq.f32.partialorder %v633_v48, 8.507059e+37 }
 0x5ae   :  { %1051 = vmatpush.xpose.msk.msra.mxu2 %vm233_vm1, %v1451_v51  ;;  %880 = vmatpush.msra.mxu3 %v1701_v13 }
 0x5af   :  { %v744_v8 = vpop.permute.xlu2 %743 }
 0x5b0   :  { %881 = vmatpush.msra.mxu3 %v1701_v13 }
 0x5b1   :  { %v1129_v42 = vpop.eup %1128 }
 0x5b2   :  { %1052 = vmatpush.xpose.msk.msra.mxu2 %vm233_vm1, %v1451_v51  ;;  %v625_v44 = vmul.f32 %v1129_v42, %v623_v40  ;;  %882 = vmatpush.msra.mxu3 %v1701_v13  ;;  %vm630_vm6 = vweird.f32 %v1129_v42 }
 0x5b3   :  { %1047 = vmatmul.msk.f32.vlgmr.msrb.gmra.mxu3 %vm233_vm1, %v667_v31  ;;  %vm631_vm8 = vmor %vm629_vm7, %vm630_vm6 }
 0x5b4   :  { %v626_v45 = vsub.f32 1.0, %v625_v44  ;;  %883 = vmatpush.msra.mxu3 %v1701_v13 }
 0x5b6   :  { %1053 = vmatpush.xpose.msk.msra.mxu2 %vm233_vm1, %v1451_v51  ;;  %v627_v34 = vmul.f32 %v1129_v42, %v626_v45  ;;  %884 = vmatpush.msra.mxu3 %v1701_v13 }
 0x5b8   :  { %v628_v49 = vadd.f32 %v1129_v42, %v627_v34  ;;  %885 = vmatpush.msra.mxu3 %v1701_v13 }
 0x5ba   :  { %1054 = vmatpush.xpose.msk.msra.mxu2 %vm233_vm1, %v1451_v51  ;;  %886 = vmatpush.msra.mxu3 %v1701_v13  ;;  %v632_v52 = vsel %vm631_vm8, %v1129_v42, %v628_v49  ;;  %vm581_vm8 = vcmask 130048  }
 0x5bb   :  { %v637_v53 = vsel %vm634_vm9, %v636_v50, %v632_v52  ;;  %vm583_vm9 = vcmask 195584  }
 0x5bc   :  { %887 = vmatpush.msra.mxu3 %v1701_v13  ;;  %v638_v55 = vmul.f32 %v1718_v22, %v637_v53 }
 0x5bd   :  { %v827_v56 = vpop.permute.xlu0 %826 }
 0x5be   :  { %1055 = vmatpush.xpose.msk.msra.mxu2 %vm233_vm1, %v1451_v51  ;;  %888 = vmatpush.msra.mxu3 %v1701_v13 }
 0x5bf   :  { %658 = vmatmul.f32.vlgmr.msrb.gmra.mxu2 %v638_v55  ;;  %1080 = vmatpush.xpose.msk.msra.mxu1 %vm233_vm1, %v827_v56 }
 0x5c0   :  { %889 = vmatpush.msra.mxu3 %v1701_v13 }
 0x5c2   :  { %1056 = vmatpush.xpose.msk.msra.mxu2 %vm233_vm1, %v1451_v51  ;;  %1081 = vmatmul.msk.f32.vlgmr.msra.gmra.mxu1 %vm233_vm1, %v825_v57 }
 0x5c3   :  { %890 = vmatpush.msra.mxu3 %v1701_v13 }
 0x5c5   :  { %891 = vmatpush.msra.mxu3 %v1701_v13  ;;  %v665_v61 = vpop.permute.xlu0 %664 }
 0x5c6   :  { %1057 = vmatpush.xpose.msk.msra.mxu2 %vm233_vm1, %v1451_v51 }
 0x5c7   :  { %892 = vmatpush.msra.mxu3 %v1701_v13 }
 0x5c9   :  { %893 = vmatpush.msra.mxu3 %v1701_v13 }
 0x5ca   :  { %1058 = vmatpush.xpose.msk.msra.mxu2 %vm233_vm1, %v1451_v51 }
 0x5ce   :  { %1059 = vmatpush.xpose.msk.msra.mxu2 %vm233_vm1, %v1451_v51 }
 0x5d2   :  { %1060 = vmatpush.xpose.msk.msra.mxu2 %vm233_vm1, %v1451_v51 }
 0x5d6   :  { %1061 = vmatpush.xpose.msk.msra.mxu2 %vm233_vm1, %v1451_v51 }
 0x5da   :  { %1062 = vmatpush.xpose.msk.msra.mxu2 %vm233_vm1, %v1451_v51 }
 0x5de   :  { %1063 = vmatpush.xpose.msk.msra.mxu2 %vm233_vm1, %v748_v58 }
 0x5e1   :  { %1064 = vmatmul.msk.f32.vlgmr.msra.gmra.mxu2 %vm233_vm1, %v746_v59 }
 0x62e   :  { %v1813_v60 = vpop.f32.mrf.mxu3 }
 0x636   :  { %v691_v23 = vpop.f32.mrf.mxu3 }
 0x637   :  { %v692_v62 = vadd.f32 %v691_v23, %v665_v61 }
 0x639   :  { %v694_v63 = vmul.f32 0.35355338, %v692_v62 }
 0x63b   :  { %v695_v1 = vsel %vm1403_vm2, %v694_v63, -1e+30 }
 0x63c   :  { %696 = vmax.xlane.f32.xlu0 %v695_v1 }
 0x63f   :  { %v849_v3 = vpop.f32.mrf.mxu1 }
 0x640   :  { %v850_v4 = vadd.f32 %v849_v3, %v823_v2 }
 0x642   :  { %v852_v6 = vmul.f32 0.35355338, %v850_v4  ;;  %v1819_v7 = vpop.f32.mrf.mxu2 }
 0x644   :  { %v853_v51 = vsel %vm1403_vm2, %v852_v6, -1e+30 }
 0x645   :  { %854 = vmax.xlane.f32.xlu1 %v853_v51 }
 0x664   :  { %v770_v9 = vpop.f32.mrf.mxu2 }
 0x665   :  { %v771_v11 = vadd.f32 %v770_v9, %v744_v8 }
 0x667   :  { %v773_v12 = vmul.f32 0.35355338, %v771_v11 }
 0x669   :  { %v774_v10 = vsel %vm1403_vm2, %v773_v12, -1e+30 }
 0x66a   :  { %775 = vmax.xlane.f32.xlu2 %v774_v10 }
 0x6af   :  { %v697_v13 = vpop.xlane.xlu0 %696 }
 0x6b0   :  { %v698_v26 = vsub.f32 %v695_v1, %v697_v13 }
 0x6b2   :  { %v699_v14 = vmul.f32 1.442695, %v698_v26 }
 0x6b4   :  { %1130 = vpow2.f32 %v699_v14 }
 0x6b8   :  { %v855_v15 = vpop.xlane.xlu1 %854 }
 0x6b9   :  { %v856_v16 = vsub.f32 %v853_v51, %v855_v15 }
 0x6ba   :  { %v1131_v17 = vpop.eup %1130 }
 0x6bb   :  { %v857_v18 = vmul.f32 1.442695, %v856_v16  ;;  %701 = vadd.xlane.f32.xlu0 %v1131_v17 }
 0x6bd   :  { %1132 = vpow2.f32 %v857_v18 }
 0x6c3   :  { %v1133_v21 = vpop.eup %1132 }
 0x6c4   :  { %859 = vadd.xlane.f32.xlu1 %v1133_v21 }
 0x6cf   :  { %718 = vrot.lane.b32.xlu0 %v1344_v28, %s1259_s13 }
 0x6d7   :  { %569 = vrot.lane.b32.xlu0 %v1682_v5, %s1246_s24 }
 0x6dd   :  { %v776_v41 = vpop.xlane.xlu2 %775  ;;  %876 = vrot.lane.b32.xlu1 %v1344_v28, %s1263_s17 }
 0x6de   :  { %v777_v22 = vsub.f32 %v774_v10, %v776_v41 }
 0x6df   :  { %573 = vrot.lane.b32.xlu0 %v1686_v0, %s1264_s18 }
 0x6e0   :  { %v778_v24 = vmul.f32 1.442695, %v777_v22 }
 0x6e2   :  { %1134 = vpow2.f32 %v778_v24 }
 0x6e8   :  { %v1831_v54 = vpop.eup %1134 }
 0x6e9   :  { %780 = vadd.xlane.f32.xlu2 %v1831_v54 }
 0x701   :  { %797 = vrot.lane.b32.xlu2 %v1344_v28, %s1261_s15 }
 0x72e   :  { %v702_v19 = vpop.xlane.xlu0 %701 }
 0x72f   :  { %1136 = vrcp.f32 %v702_v19  ;;  %v714_v30 = vand.u32 2147483648, %v702_v19  ;;  %v712_v32 = vand.u32 2147483647, %v702_v19  ;;  %vm708_vm10 = vweird.f32 %v702_v19 }
 0x731   :  { %v715_v33 = vor.u32 1.1754944e-38, %v714_v30  ;;  %vm713_vm12 = vcmp.eq.f32.partialorder %v712_v32, 8.507059e+37 }
 0x735   :  { %v1137_v5 = vpop.eup %1136 }
 0x736   :  { %v704_v25 = vmul.f32 %v1137_v5, %v702_v19  ;;  %vm709_vm2 = vweird.f32 %v1137_v5 }
 0x737   :  { %v860_v27 = vpop.xlane.xlu1 %859  ;;  %vm710_vm11 = vmor %vm708_vm10, %vm709_vm2 }
 0x738   :  { %v705_v29 = vsub.f32 1.0, %v704_v25  ;;  %1138 = vrcp.f32 %v860_v27  ;;  %v872_v44 = vand.u32 2147483648, %v860_v27  ;;  %vm866_vm14 = vweird.f32 %v860_v27 }
 0x739   :  { %v870_v45 = vand.u32 2147483647, %v860_v27 }
 0x73a   :  { %v706_v31 = vmul.f32 %v1137_v5, %v705_v29  ;;  %v873_v34 = vor.u32 1.1754944e-38, %v872_v44 }
 0x73b   :  { %vm871_vm3 = vcmp.eq.f32.partialorder %v870_v45, 8.507059e+37 }
 0x73c   :  { %v707_v0 = vadd.f32 %v1137_v5, %v706_v31 }
 0x73e   :  { %v1139_v35 = vpop.eup %1138  ;;  %v711_v36 = vsel %vm710_vm11, %v1137_v5, %v707_v0 }
 0x73f   :  { %v862_v43 = vmul.f32 %v1139_v35, %v860_v27  ;;  %v716_v28 = vsel %vm713_vm12, %v715_v33, %v711_v36  ;;  %vm867_vm13 = vweird.f32 %v1139_v35 }
 0x740   :  { %v717_v37 = vmul.f32 %v1131_v17, %v716_v28  ;;  %vm868_vm15 = vmor %vm866_vm14, %vm867_vm13 }
 0x741   :  { %v863_v38 = vsub.f32 1.0, %v862_v43  ;;  %v719_v39 = vpop.permute.xlu0 %718 }
 0x742   :  { %736 = vmatpush.msrb.mxu0 %v719_v39 }
 0x743   :  { %v864_v40 = vmul.f32 %v1139_v35, %v863_v38  ;;  %737 = vmatmul.f32.vlgmr.msrb.gmra.mxu0 %v717_v37 }
 0x744   :  { %800 = vmatpush.msra.mxu0 %v1580_v47 }
 0x745   :  { %v865_v42 = vadd.f32 %v1139_v35, %v864_v40 }
 0x746   :  { %801 = vmatpush.msra.mxu0 %v1580_v47 }
 0x747   :  { %v869_v46 = vsel %vm868_vm15, %v1139_v35, %v865_v42 }
 0x748   :  { %802 = vmatpush.msra.mxu0 %v1580_v47  ;;  %v874_v48 = vsel %vm871_vm3, %v873_v34, %v869_v46 }
 0x749   :  { %v875_v50 = vmul.f32 %v1133_v21, %v874_v48  ;;  %v570_v6 = vpop.permute.xlu0 %569 }
 0x74a   :  { %803 = vmatpush.msra.mxu0 %v1580_v47  ;;  %v580_v9 = vsel %vm233_vm1, %v1544_v20, %v570_v6 }
 0x74c   :  { %804 = vmatpush.msra.mxu0 %v1580_v47 }
 0x74e   :  { %805 = vmatpush.msra.mxu0 %v1580_v47 }
 0x74f   :  { %v877_v49 = vpop.permute.xlu1 %876 }
 0x750   :  { %806 = vmatpush.msra.mxu0 %v1580_v47  ;;  %894 = vmatpush.msra.mxu3 %v877_v49 }
 0x751   :  { %895 = vmatmul.f32.vlgmr.msra.gmra.mxu3 %v875_v50  ;;  %v574_v8 = vpop.permute.xlu0 %573 }
 0x752   :  { %807 = vmatpush.msra.mxu0 %v1580_v47  ;;  %v582_v11 = vsel %vm581_vm8, %v580_v9, %v574_v8 }
 0x754   :  { %808 = vmatpush.msra.mxu0 %v1580_v47 }
 0x756   :  { %809 = vmatpush.msra.mxu0 %v1580_v47 }
 0x758   :  { %810 = vmatpush.msra.mxu0 %v1580_v47 }
 0x75a   :  { %811 = vmatpush.msra.mxu0 %v1580_v47 }
 0x75c   :  { %v781_v52 = vpop.xlane.xlu2 %780  ;;  %812 = vmatpush.msra.mxu0 %v1580_v47 }
 0x75d   :  { %1140 = vrcp.f32 %v781_v52  ;;  %v793_v58 = vand.u32 2147483648, %v781_v52  ;;  %v791_v61 = vand.u32 2147483647, %v781_v52  ;;  %vm787_vm5 = vweird.f32 %v781_v52 }
 0x75e   :  { %813 = vmatpush.msra.mxu0 %v1580_v47 }
 0x75f   :  { %v794_v62 = vor.u32 1.1754944e-38, %v793_v58  ;;  %vm792_vm7 = vcmp.eq.f32.partialorder %v791_v61, 8.507059e+37 }
 0x760   :  { %814 = vmatpush.msra.mxu0 %v1580_v47 }
 0x763   :  { %v1141_v53 = vpop.eup %1140 }
 0x764   :  { %v783_v55 = vmul.f32 %v1141_v53, %v781_v52  ;;  %v798_v56 = vpop.permute.xlu2 %797  ;;  %vm788_vm4 = vweird.f32 %v1141_v53 }
 0x765   :  { %815 = vmatpush.msra.mxu0 %v798_v56  ;;  %vm789_vm6 = vmor %vm787_vm5, %vm788_vm4 }
 0x766   :  { %v784_v57 = vsub.f32 1.0, %v783_v55 }
 0x768   :  { %v785_v59 = vmul.f32 %v1141_v53, %v784_v57 }
 0x76a   :  { %v786_v23 = vadd.f32 %v1141_v53, %v785_v59 }
 0x76c   :  { %v790_v63 = vsel %vm789_vm6, %v1141_v53, %v786_v23 }
 0x76d   :  { %v795_v1 = vsel %vm792_vm7, %v794_v62, %v790_v63 }
 0x76e   :  { %v796_v2 = vmul.f32 %v1831_v54, %v795_v1 }
 0x770   :  { %816 = vmatmul.f32.vlgmr.msra.gmra.mxu0 %v796_v2 }
 0x7c0   :  { %v738_v47 = vpop.f32.mrf.mxu0 }
 0x7c1   :  { %900 = vrot.lane.b32.xlu1 %v738_v47, %s1246_s24 }
 0x7c9   :  { %577 = vrot.lane.b32.xlu1 %v1813_v60, %s1265_s19 }
 0x7d4   :  { %v896_v3 = vpop.f32.mrf.mxu3 }
 0x7d5   :  { %908 = vrot.lane.b32.xlu0 %v896_v3, %s1265_s19 }
 0x7ed   :  { %v817_v4 = vpop.f32.mrf.mxu0 }
 0x7ee   :  { %904 = vrot.lane.b32.xlu2 %v817_v4, %s1264_s18 }
 0x833   :  { %v901_v51 = vpop.permute.xlu1 %900 }
 0x834   :  { %v911_v60 = vsel %vm233_vm1, %v1819_v7, %v901_v51 }
 0x83b   :  { %v578_v12 = vpop.permute.xlu1 %577 }
 0x83c   :  { %v584_v10 = vsel %vm583_vm9, %v582_v11, %v578_v12 }
 0x83d   :  { %914 = vst.msk [vmem:[#allocation8] sm:$0xff] %vm75_vm0, %v584_v10 }
 0x847   :  { %v909_v26 = vpop.permute.xlu0 %908 }
 0x848   :  { %v905_v13 = vpop.permute.xlu2 %904 }
 0x849   :  { %v912_v14 = vsel %vm581_vm8, %v911_v60, %v905_v13 }
 0x84a   :  { %v913_v20 = vsel %vm583_vm9, %v912_v14, %v909_v26 }
 0x84b   :  { %915 = vst.msk [vmem:[#allocation8 + $0x8] sm:$0xff] %vm75_vm0, %v913_v20 }
 0x84c   :  { %928 = dma.vmem_to_hbm [thread:$0]  %s921_s21, 256, %s923_s26, [#allocation4], %s1245_s23, %s1245_s23, %s1246_s24  }
 0x84d   :  { %1242 = dma.done.wait [#allocation4], 256  }
 0x84e   :  { %1243 = vsyncadd [#allocation4], 4294967040 }
 0x84f   :  { %933 = vsyncpa [#allocation3], 1 }
 0x850   :  { %934 = vsyncpa [#allocation6], 1 }
 0x851   :  { %935 = vsyncpa [#allocation4], 1 }

</bundles_post_ra>
